<compile_context>
chip_gen: v7x
topology: tpu7x:2x2x1
jax: 0.10.0
libtpu: 0.0.40
codegen_flags: <defaults>
</compile_context>

<pallas_src>
import jax
import jax.numpy as jnp
from jax.experimental import pallas as pl
from jax.experimental.pallas import tpu as pltpu

EPS = 1e-5


# ----------------------------------------------------------------------------
# helpers
# ----------------------------------------------------------------------------
def _round_up(x, m):
    return ((x + m - 1) // m) * m


def _pad_to(a, shape):
    pads = [(0, s - d) for d, s in zip(a.shape, shape)]
    return jnp.pad(a, pads)


def _pick_time_block(t, max_tt=8):
    """Largest divisor of t that is <= max_tt; if only tiny divisors exist,
    use max_tt and pad the time axis (guarded inside the kernel)."""
    cap = max(1, min(max_tt, t))
    best = 1
    for tt in range(cap, 1, -1):
        if t % tt == 0:
            best = tt
            break
    if best >= (cap + 1) // 2:
        return best
    return cap


# ----------------------------------------------------------------------------
# parameter preparation (LayerNorm-affine folding + gate-block padding + cast)
# ----------------------------------------------------------------------------
def prepare_params(params, weights_dtype=jnp.bfloat16):
    f32 = jnp.float32
    OBS = params["w1"].shape[0]
    H = params["w2"].shape[1]
    A = params["wout"].shape[1]
    HP, AP = _round_up(H, 128), _round_up(A, 128)

    # fold ln0 affine into w1/b1:   (x_norm*g + b) @ w1 + b1
    g0 = params["ln0_g"].reshape(OBS, 1)
    w1f = g0 * params["w1"]                              # diag(gamma) @ w1
    b1f = params["b1"] + params["ln0_b"] @ params["w1"]

    # fold lnr affine into wout/bout
    gr = params["lnr_g"].reshape(H, 1)
    woutf = gr * params["wout"]
    boutf = params["bout"] + params["lnr_b"] @ params["wout"]

    # GRU weights (gate order r,z,n): pad each gate block to HP lanes so every
    # slice taken in the kernel lands on a 128-lane boundary.  No zero blocks.
    wih, whh = params["wih"], params["whh"]              # (H, 3H)
    bih, bhh = params["bih"], params["bhh"]              # (1, 3H)

    def gate_pad(w):                                     # (H, 3H) -> (HP, 3*HP)
        blocks = [_pad_to(w[:, i * H:(i + 1) * H], (H, HP)) for i in range(3)]
        return _pad_to(jnp.concatenate(blocks, axis=1), (HP, 3 * HP))

    wih_p = gate_pad(wih)
    whh_p = gate_pad(whh)
    # r/z biases: input+hidden contributions can be pre-summed; the n-gate
    # biases MUST stay split because r multiplies only the hidden contribution.
    brz = jnp.concatenate(
        [_pad_to(bih[:, :H] + bhh[:, :H], (1, HP)),
         _pad_to(bih[:, H:2 * H] + bhh[:, H:2 * H], (1, HP))], axis=1)
    bin_p = _pad_to(bih[:, 2 * H:], (1, HP))
    bhn_p = _pad_to(bhh[:, 2 * H:], (1, HP))

    wdt = weights_dtype
    return {
        "w1": _pad_to(w1f, (OBS, HP)).astype(wdt),   # contraction dim stays OBS
        "b1": _pad_to(b1f, (1, HP)).astype(f32),
        "w2": _pad_to(params["w2"], (HP, HP)).astype(wdt),
        "b2": _pad_to(params["b2"], (1, HP)).astype(f32),
        "wih": wih_p.astype(wdt),
        "whh": whh_p.astype(wdt),
        "brz": brz.astype(f32),
        "bin": bin_p.astype(f32),
        "bhn": bhn_p.astype(f32),
        "wout": _pad_to(woutf, (HP, AP)).astype(wdt),
        "bout": _pad_to(boutf, (1, AP)).astype(f32),
        "dims": (OBS, H, A, HP, AP),
    }


# ----------------------------------------------------------------------------
# kernel
# ----------------------------------------------------------------------------
def _make_kernel(hidden, HP, TT, t_true, t_padded):
    inv_h = 1.0 / float(hidden)
    needs_t_guard = (t_padded != t_true)

    def kernel(obs_ref, h0_ref, mask_ref,
               w1_ref, b1_ref, w2_ref, b2_ref,
               wih_ref, whh_ref, brz_ref, bin_ref, bhn_ref,
               wout_ref, bout_ref,
               act_ref, hout_ref, h_scr):
        f32 = jnp.float32
        wdt = w1_ref.dtype
        tblk = pl.program_id(1)

        @pl.when(tblk == 0)
        def _():
            h_scr[...] = h0_ref[...]

        # loop-invariant bias loads hoisted out of the time loop
        b1 = b1_ref[...]
        b2 = b2_ref[...]
        brz = brz_ref[...]
        b_in = bin_ref[...]
        b_hn = bhn_ref[...]
        bout = bout_ref[...]

        def step(tt, h):
            # ---- base MLP: LayerNorm(obs) -> Linear+ReLU -> Linear+ReLU ----
            # obs is at TRUE feature width (no lane padding); two-pass moments.
            o = obs_ref[tt]                                     # (TB, OBS) f32
            mu = jnp.mean(o, axis=-1, keepdims=True)
            d = o - mu
            var = jnp.mean(d * d, axis=-1, keepdims=True)
            x = d * jax.lax.rsqrt(var + EPS)
            x = jnp.maximum(
                jnp.dot(x.astype(wdt), w1_ref[...],
                        preferred_element_type=f32) + b1, 0.0)
            x = jnp.maximum(
                jnp.dot(x.astype(wdt), w2_ref[...],
                        preferred_element_type=f32) + b2, 0.0)

            # ---- GRU cell (gate order r,z,n): two MXU pushes, no zero blocks
            hm = h * mask_ref[tt]                     # (TB, HP) * (TB, 1)
            gi = jnp.dot(x.astype(wdt), wih_ref[...],
                         preferred_element_type=f32)            # (TB, 3*HP)
            gh = jnp.dot(hm.astype(wdt), whh_ref[...],
                         preferred_element_type=f32)            # (TB, 3*HP)
            # one contiguous sigmoid over the (TB, 2*HP) r|z slab (EUP-friendly)
            rz = jax.nn.sigmoid(gi[:, :2 * HP] + gh[:, :2 * HP] + brz)
            r = rz[:, :HP]
            z = rz[:, HP:]
            n = jnp.tanh(gi[:, 2 * HP:] + b_in + r * (gh[:, 2 * HP:] + b_hn))
            h_new = (1.0 - z) * n + z * hm

            # ---- LayerNorm(h') (affine folded into wout/bout) + output head
            # one-pass moments with the TRUE count: padded lanes of h_new are 0
            # and h is bounded, so E[x^2]-mu^2 is numerically safe here.
            mu_h = jnp.sum(h_new, axis=-1, keepdims=True) * inv_h
            ex2 = jnp.sum(h_new * h_new, axis=-1, keepdims=True) * inv_h
            feat = (h_new - mu_h) * jax.lax.rsqrt(ex2 - mu_h * mu_h + EPS)
            act_ref[tt] = (jnp.dot(feat.astype(wdt), wout_ref[...],
                                   preferred_element_type=f32) + bout)

            if needs_t_guard:
                # trailing padded timesteps must not advance the hidden state
                h_new = jnp.where(tblk * TT + tt < t_true, h_new, h)
            return h_new

        h = jax.lax.fori_loop(0, TT, step, h_scr[...], unroll=True)
        h_scr[...] = h
        # hout block index is t-invariant -> stays VMEM-resident; the write
        # after the last time block is what gets flushed to HBM.
        hout_ref[...] = h

    return kernel


# ----------------------------------------------------------------------------
# wrapper
# ----------------------------------------------------------------------------
_WEIGHT_SINGLE_BUFFER = [True]   # flipped off if pl.Buffered(1) is rejected


def _vmem_limit_bytes(OBS, HP, AP, TB, TT, weights_dtype):
    wsz = jnp.dtype(weights_dtype).itemsize
    weights = (OBS * HP + HP * HP + 2 * HP * 3 * HP + HP * AP) * wsz
    biases = (6 * HP + AP) * 4
    streamed = 2 * 4 * (TT * TB * (OBS + 1 + AP) + 2 * TB * HP)  # dbl-buffered
    scratch = TB * HP * 4
    est = 2 * (weights + biases) + streamed + scratch            # conservative
    return int(min(max(est * 3 // 2 + (8 << 20), 16 << 20), 64 << 20))


def rnnnet_forward(obs, rnn_states, masks, params, *,
                   weights_dtype=jnp.bfloat16, max_time_block=8):
    """obs: (B, OBS) or (T, B, OBS); masks: (B, 1) or (T, B, 1);
       rnn_states: (B, L, H).  Returns (act, new_rnn_states)."""
    single_step = (obs.ndim == 2)
    if single_step:
        obs = obs[None]
        masks = masks[None]
    T, B, OBS = obs.shape
    L = rnn_states.shape[1]
    assert L == 1, "kernel implements rnn_layer_num == 1"
    # TODO(synk): rnn_layer_num > 1 (stacked GRU) not implemented; L == 1 only.
    H = params["w2"].shape[1]
    A = params["wout"].shape[1]

    prep = prepare_params(params, weights_dtype)
    _, _, _, HP, AP = prep["dims"]

    # batch tile: multiple of 8 sublanes; aim for >=2 tiles when B allows so
    # the "parallel" batch axis shards across both v7x TensorCores; 256 rows
    # on very large batches to feed the 2x256x256 MXUs on v6e/v7x.
    if B >= 512:
        TB = 256
    elif B >= 256:
        TB = 128
    elif B >= 16:
        TB = _round_up((B + 1) // 2, 8)
    else:
        TB = _round_up(B, 8)
    Bp = _round_up(B, TB)

    TT = _pick_time_block(T, max_time_block)
    Tp = _round_up(T, TT)

    f32 = jnp.float32
    obs_p = _pad_to(obs.astype(f32), (Tp, Bp, OBS))          # true lane width
    masks_p = _pad_to(masks.astype(f32).reshape(T, B, 1), (Tp, Bp, 1))
    h0_p = _pad_to(rnn_states.reshape(B, H).astype(f32), (Bp, HP))

    kernel = _make_kernel(H, HP, TT, T, Tp)
    grid = (Bp // TB, Tp // TT)
    vmem_bytes = _vmem_limit_bytes(OBS, HP, AP, TB, TT, weights_dtype)

    weight_arrays = (prep["w1"], prep["b1"], prep["w2"], prep["b2"],
                     prep["wih"], prep["whh"], prep["brz"], prep["bin"],
                     prep["bhn"], prep["wout"], prep["bout"])

    def build_and_run(single_buffer_weights):
        def wspec(arr):
            # grid-invariant weights/biases: single-buffer if supported
            if single_buffer_weights:
                return pl.BlockSpec(arr.shape, lambda b, t: (0, 0),
                                    pipeline_mode=pl.Buffered(1))
            return pl.BlockSpec(arr.shape, lambda b, t: (0, 0))

        in_specs = [
            pl.BlockSpec((TT, TB, OBS), lambda b, t: (t, b, 0)),  # obs chunk
            pl.BlockSpec((TB, HP), lambda b, t: (b, 0)),          # initial h
            pl.BlockSpec((TT, TB, 1), lambda b, t: (t, b, 0)),    # masks (1 lane)
        ] + [wspec(a) for a in weight_arrays]
        out_specs = (
            pl.BlockSpec((TT, TB, AP), lambda b, t: (t, b, 0)),   # acts chunk
            pl.BlockSpec((TB, HP), lambda b, t: (b, 0)),          # final hidden
        )
        return pl.pallas_call(
            kernel,
            out_shape=(
                jax.ShapeDtypeStruct((Tp, Bp, AP), f32),
                jax.ShapeDtypeStruct((Bp, HP), f32),
            ),
            grid_spec=pltpu.PrefetchScalarGridSpec(
                num_scalar_prefetch=0,
                grid=grid,
                in_specs=in_specs,
                out_specs=out_specs,
                scratch_shapes=[pltpu.VMEM((TB, HP), f32)],
            ),
            compiler_params=pltpu.CompilerParams(
                dimension_semantics=("parallel", "arbitrary"),
                vmem_limit_bytes=vmem_bytes),
        )(obs_p, h0_p, masks_p, *weight_arrays)

    if _WEIGHT_SINGLE_BUFFER[0]:
        try:
            act_p, hout_p = build_and_run(True)
        except Exception:
            _WEIGHT_SINGLE_BUFFER[0] = False
            act_p, hout_p = build_and_run(False)
    else:
        act_p, hout_p = build_and_run(False)

    act = act_p[:T, :B, :A]
    h_new = hout_p[:B, :H].reshape(B, L, H)
    if single_step:
        act = act[0]
    return act, h_new


# ----------------------------------------------------------------------------
# synthetic parameters + pure-JAX reference
# ----------------------------------------------------------------------------
def make_params(key, obs_dim, hidden, act_dim):
    """Deterministic synthetic init (xavier-uniform-ish), not a checkpoint."""
    ks = jax.random.split(key, 8)

    def xavier(k, fan_in, fan_out):
        lim = (6.0 / (fan_in + fan_out)) ** 0.5
        return jax.random.uniform(k, (fan_in, fan_out), jnp.float32, -lim, lim)

    H = hidden
    return {
        "ln0_g": jnp.ones((1, obs_dim), jnp.float32),
        "ln0_b": jnp.zeros((1, obs_dim), jnp.float32),
        "w1": xavier(ks[0], obs_dim, H), "b1": jnp.zeros((1, H), jnp.float32),
        "w2": xavier(ks[1], H, H),       "b2": jnp.zeros((1, H), jnp.float32),
        # GRU (stored transposed: (in, 3H) so kernel does x @ W), gate order r,z,n
        "wih": xavier(ks[2], H, 3 * H),
        "whh": xavier(ks[3], H, 3 * H),
        "bih": jnp.zeros((1, 3 * H), jnp.float32),
        "bhh": jnp.zeros((1, 3 * H), jnp.float32),
        "lnr_g": jnp.ones((1, H), jnp.float32),
        "lnr_b": jnp.zeros((1, H), jnp.float32),
        "wout": xavier(ks[4], H, act_dim),
        "bout": jnp.zeros((1, act_dim), jnp.float32),
    }


def rnnnet_reference(obs, rnn_states, masks, params):
    """Pure-JAX reference mirroring the torch forward (scan over T if given)."""
    single = (obs.ndim == 2)
    if single:
        obs = obs[None]
        masks = masks[None]
    H = params["w2"].shape[1]

    def ln(x, g, b):
        mu = jnp.mean(x, axis=-1, keepdims=True)
        var = jnp.mean((x - mu) ** 2, axis=-1, keepdims=True)
        return (x - mu) * jax.lax.rsqrt(var + EPS) * g + b

    def step(h, inp):
        o, m = inp
        x = ln(o, params["ln0_g"], params["ln0_b"])
        x = jnp.maximum(x @ params["w1"] + params["b1"], 0.0)
        x = jnp.maximum(x @ params["w2"] + params["b2"], 0.0)
        hm = h * m
        gi = x @ params["wih"] + params["bih"]
        gh = hm @ params["whh"] + params["bhh"]
        r = jax.nn.sigmoid(gi[:, :H] + gh[:, :H])
        z = jax.nn.sigmoid(gi[:, H:2 * H] + gh[:, H:2 * H])
        n = jnp.tanh(gi[:, 2 * H:] + r * gh[:, 2 * H:])
        h_new = (1.0 - z) * n + z * hm
        feat = ln(h_new, params["lnr_g"], params["lnr_b"])
        act = feat @ params["wout"] + params["bout"]
        return h_new, act

    h0 = rnn_states[:, 0, :]
    h_last, acts = jax.lax.scan(step, h0, (obs, masks))
    if single:
        acts = acts[0]
    return acts, h_last[:, None, :]


# ----------------------------------------------------------------------------
# test
# ----------------------------------------------------------------------------
if __name__ == "__main__":
    B, OBS, H, A, L, T = 4, 16, 32, 8, 1, 6

    key = jax.random.PRNGKey(0)
    k_obs, k_h, k_m, k_p, k_obs2, k_m2 = jax.random.split(key, 6)

    params = make_params(k_p, OBS, H, A)
    rnn_states = jax.random.normal(k_h, (B, L, H), jnp.float32)

    # --- single step (matches RNNNet.forward call signature), exact f32 path ---
    obs = jax.random.normal(k_obs, (B, OBS), jnp.float32)
    masks = (jax.random.uniform(k_m, (B, 1)) > 0.3).astype(jnp.float32)
    act, new_states = rnnnet_forward(obs, rnn_states, masks, params,
                                     weights_dtype=jnp.float32)
    jax.block_until_ready((act, new_states))
    act_ref, states_ref = rnnnet_reference(obs, rnn_states, masks, params)
    assert act.shape == (B, A) and new_states.shape == (B, L, H)
    assert jnp.allclose(act, act_ref, atol=1e-4, rtol=1e-4)
    assert jnp.allclose(new_states, states_ref, atol=1e-4, rtol=1e-4)

    # --- multi-step rollout: time loop blocked inside the kernel (f32) ---
    obs_seq = jax.random.normal(k_obs2, (T, B, OBS), jnp.float32)
    masks_seq = (jax.random.uniform(k_m2, (T, B, 1)) > 0.2).astype(jnp.float32)
    act_seq, hT = rnnnet_forward(obs_seq, rnn_states, masks_seq, params,
                                 weights_dtype=jnp.float32)
    jax.block_until_ready((act_seq, hT))
    act_seq_ref, hT_ref = rnnnet_reference(obs_seq, rnn_states, masks_seq, params)
    assert act_seq.shape == (T, B, A) and hT.shape == (B, L, H)
    assert jnp.allclose(act_seq, act_seq_ref, atol=5e-4, rtol=5e-4)
    assert jnp.allclose(hT, hT_ref, atol=5e-4, rtol=5e-4)

    # --- bf16 MXU operands (f32 accumulate, f32 elementwise math): loose check ---
    act_bf, h_bf = rnnnet_forward(obs_seq, rnn_states, masks_seq, params,
                                  weights_dtype=jnp.bfloat16)
    jax.block_until_ready((act_bf, h_bf))
    assert jnp.allclose(act_bf, act_seq_ref, atol=0.2, rtol=0.2)
    assert jnp.allclose(h_bf, hT_ref, atol=0.2, rtol=0.2)

    print("KERNEL_OK")
</pallas_src>

<mosaic_0001>
module attributes {stable_mosaic.version = 11 : i64} {
  func.func @kernel(%arg0: i32, %arg1: i32, %arg2: memref<1x8x16xf32, #tpu.memory_space<vmem>>, %arg3: memref<8x128xf32, #tpu.memory_space<vmem>>, %arg4: memref<1x8x1xf32, #tpu.memory_space<vmem>>, %arg5: memref<16x128xf32, #tpu.memory_space<vmem>>, %arg6: memref<1x128xf32, #tpu.memory_space<vmem>>, %arg7: memref<128x128xf32, #tpu.memory_space<vmem>>, %arg8: memref<1x128xf32, #tpu.memory_space<vmem>>, %arg9: memref<128x384xf32, #tpu.memory_space<vmem>>, %arg10: memref<128x384xf32, #tpu.memory_space<vmem>>, %arg11: memref<1x256xf32, #tpu.memory_space<vmem>>, %arg12: memref<1x128xf32, #tpu.memory_space<vmem>>, %arg13: memref<1x128xf32, #tpu.memory_space<vmem>>, %arg14: memref<128x128xf32, #tpu.memory_space<vmem>>, %arg15: memref<1x128xf32, #tpu.memory_space<vmem>>, %arg16: memref<1x8x128xf32, #tpu.memory_space<vmem>>, %arg17: memref<8x128xf32, #tpu.memory_space<vmem>>, %arg18: memref<8x128xf32, #tpu.memory_space<vmem>>) attributes {dimension_semantics = [#tpu.dimension_semantics<parallel>, #tpu.dimension_semantics<arbitrary>], iteration_bounds = array<i64: 1, 1>, scalar_prefetch = 0 : i64, scratch_operands = 1 : i64, tpu.core_type = #tpu.core_type<tc>, window_params = [{transform_indices = @transform_0, window_bounds = array<i64: 1, 8, 16>}, {transform_indices = @transform_1, window_bounds = array<i64: 8, 128>}, {transform_indices = @transform_2, window_bounds = array<i64: 1, 8, 1>}, {pipeline_mode = #tpu.pipeline_mode<synchronous>, transform_indices = @transform_3, window_bounds = array<i64: 16, 128>}, {pipeline_mode = #tpu.pipeline_mode<synchronous>, transform_indices = @transform_4, window_bounds = array<i64: 1, 128>}, {pipeline_mode = #tpu.pipeline_mode<synchronous>, transform_indices = @transform_5, window_bounds = array<i64: 128, 128>}, {pipeline_mode = #tpu.pipeline_mode<synchronous>, transform_indices = @transform_6, window_bounds = array<i64: 1, 128>}, {pipeline_mode = #tpu.pipeline_mode<synchronous>, transform_indices = @transform_7, window_bounds = array<i64: 128, 384>}, {pipeline_mode = #tpu.pipeline_mode<synchronous>, transform_indices = @transform_8, window_bounds = array<i64: 128, 384>}, {pipeline_mode = #tpu.pipeline_mode<synchronous>, transform_indices = @transform_9, window_bounds = array<i64: 1, 256>}, {pipeline_mode = #tpu.pipeline_mode<synchronous>, transform_indices = @transform_10, window_bounds = array<i64: 1, 128>}, {pipeline_mode = #tpu.pipeline_mode<synchronous>, transform_indices = @transform_11, window_bounds = array<i64: 1, 128>}, {pipeline_mode = #tpu.pipeline_mode<synchronous>, transform_indices = @transform_12, window_bounds = array<i64: 128, 128>}, {pipeline_mode = #tpu.pipeline_mode<synchronous>, transform_indices = @transform_13, window_bounds = array<i64: 1, 128>}, {transform_indices = @transform_14, window_bounds = array<i64: 1, 8, 128>}, {transform_indices = @transform_15, window_bounds = array<i64: 8, 128>}]} {
    %c0_i32 = arith.constant 0 : i32
    %0 = arith.cmpi eq, %arg1, %c0_i32 : i32
    %1 = arith.extui %0 : i1 to i32
    %c0_i32_0 = arith.constant 0 : i32
    %2 = arith.cmpi ne, %1, %c0_i32_0 : i32
    scf.if %2 {
      %c0_53 = arith.constant 0 : index
      %c0_54 = arith.constant 0 : index
      %104 = vector.load %arg3[%c0_53, %c0_54] : memref<8x128xf32, #tpu.memory_space<vmem>>, vector<8x128xf32>
      %c0_55 = arith.constant 0 : index
      %c0_56 = arith.constant 0 : index
      %105 = vector.load %arg18[%c0_55, %c0_56] : memref<8x128xf32, #tpu.memory_space<vmem>>, vector<8x128xf32>
      tpu.vector_store %arg18[%c0_55, %c0_56], %104 {strides = array<i32>} : memref<8x128xf32, #tpu.memory_space<vmem>>, vector<8x128xf32>,
    } else {
    }
    %c0 = arith.constant 0 : index
    %c0_1 = arith.constant 0 : index
    %3 = vector.load %arg6[%c0, %c0_1] : memref<1x128xf32, #tpu.memory_space<vmem>>, vector<1x128xf32>
    %c0_2 = arith.constant 0 : index
    %c0_3 = arith.constant 0 : index
    %4 = vector.load %arg8[%c0_2, %c0_3] : memref<1x128xf32, #tpu.memory_space<vmem>>, vector<1x128xf32>
    %c0_4 = arith.constant 0 : index
    %c0_5 = arith.constant 0 : index
    %5 = vector.load %arg11[%c0_4, %c0_5] : memref<1x256xf32, #tpu.memory_space<vmem>>, vector<1x256xf32>
    %c0_6 = arith.constant 0 : index
    %c0_7 = arith.constant 0 : index
    %6 = vector.load %arg12[%c0_6, %c0_7] : memref<1x128xf32, #tpu.memory_space<vmem>>, vector<1x128xf32>
    %c0_8 = arith.constant 0 : index
    %c0_9 = arith.constant 0 : index
    %7 = vector.load %arg13[%c0_8, %c0_9] : memref<1x128xf32, #tpu.memory_space<vmem>>, vector<1x128xf32>
    %c0_10 = arith.constant 0 : index
    %c0_11 = arith.constant 0 : index
    %8 = vector.load %arg15[%c0_10, %c0_11] : memref<1x128xf32, #tpu.memory_space<vmem>>, vector<1x128xf32>
    %c0_12 = arith.constant 0 : index
    %c0_13 = arith.constant 0 : index
    %9 = vector.load %arg18[%c0_12, %c0_13] : memref<8x128xf32, #tpu.memory_space<vmem>>, vector<8x128xf32>
    %c0_i32_14 = arith.constant 0 : i32
    %10 = arith.index_cast %c0_i32_14 : i32 to index
    %c0_15 = arith.constant 0 : index
    %c0_16 = arith.constant 0 : index
    %11 = vector.load %arg2[%10, %c0_15, %c0_16] : memref<1x8x16xf32, #tpu.memory_space<vmem>>, vector<1x8x16xf32>
    %12 = vector.shape_cast %11 : vector<1x8x16xf32> to vector<8x16xf32>
    %cst = arith.constant dense<0.000000e+00> : vector<8xf32>
    %13 = vector.multi_reduction <add>, %12, %cst [1] : vector<8x16xf32> to vector<8xf32>
    %14 = vector.shape_cast %13 : vector<8xf32> to vector<8x1xf32>
    %cst_17 = arith.constant 1.600000e+01 : f32
    %15 = vector.broadcast %cst_17 : f32 to vector<8x1xf32>
    %16 = arith.divf %14, %15 : vector<8x1xf32>
    %17 = vector.broadcast %16 : vector<8x1xf32> to vector<8x16xf32>
    %18 = arith.subf %12, %17 : vector<8x16xf32>
    %19 = arith.mulf %18, %18 : vector<8x16xf32>
    %cst_18 = arith.constant dense<0.000000e+00> : vector<8xf32>
    %20 = vector.multi_reduction <add>, %19, %cst_18 [1] : vector<8x16xf32> to vector<8xf32>
    %21 = vector.shape_cast %20 : vector<8xf32> to vector<8x1xf32>
    %cst_19 = arith.constant 1.600000e+01 : f32
    %22 = vector.broadcast %cst_19 : f32 to vector<8x1xf32>
    %23 = arith.divf %21, %22 : vector<8x1xf32>
    %cst_20 = arith.constant 9.99999974E-6 : f32
    %24 = vector.broadcast %cst_20 : f32 to vector<8x1xf32>
    %25 = arith.addf %23, %24 : vector<8x1xf32>
    %26 = math.rsqrt %25 : vector<8x1xf32>
    %27 = vector.broadcast %26 : vector<8x1xf32> to vector<8x16xf32>
    %28 = arith.mulf %18, %27 : vector<8x16xf32>
    %c0_21 = arith.constant 0 : index
    %c0_22 = arith.constant 0 : index
    %29 = vector.load %arg5[%c0_21, %c0_22] : memref<16x128xf32, #tpu.memory_space<vmem>>, vector<16x128xf32>
    %cst_23 = arith.constant dense<0.000000e+00> : vector<8x128xf32>
    %30 = tpu.matmul %28, %29, %cst_23 {dimension_numbers = #tpu.dot_dimension_numbers<[1], [0], [0], [1], [0, 0, 1, 1], [], []>} : vector<8x16xf32>, vector<16x128xf32>, vector<8x128xf32> -> vector<8x128xf32>
    %31 = vector.broadcast %3 : vector<1x128xf32> to vector<8x128xf32>
    %32 = arith.addf %30, %31 : vector<8x128xf32>
    %cst_24 = arith.constant 0.000000e+00 : f32
    %33 = vector.broadcast %cst_24 : f32 to vector<8x128xf32>
    %34 = arith.maximumf %32, %33 : vector<8x128xf32>
    %c0_25 = arith.constant 0 : index
    %c0_26 = arith.constant 0 : index
    %35 = vector.load %arg7[%c0_25, %c0_26] : memref<128x128xf32, #tpu.memory_space<vmem>>, vector<128x128xf32>
    %cst_27 = arith.constant dense<0.000000e+00> : vector<8x128xf32>
    %36 = tpu.matmul %34, %35, %cst_27 {dimension_numbers = #tpu.dot_dimension_numbers<[1], [0], [0], [1], [0, 0, 1, 1], [], []>} : vector<8x128xf32>, vector<128x128xf32>, vector<8x128xf32> -> vector<8x128xf32>
    %37 = vector.broadcast %4 : vector<1x128xf32> to vector<8x128xf32>
    %38 = arith.addf %36, %37 : vector<8x128xf32>
    %cst_28 = arith.constant 0.000000e+00 : f32
    %39 = vector.broadcast %cst_28 : f32 to vector<8x128xf32>
    %40 = arith.maximumf %38, %39 : vector<8x128xf32>
    %41 = arith.index_cast %c0_i32_14 : i32 to index
    %c0_29 = arith.constant 0 : index
    %c0_30 = arith.constant 0 : index
    %42 = vector.load %arg4[%41, %c0_29, %c0_30] : memref<1x8x1xf32, #tpu.memory_space<vmem>>, vector<1x8x1xf32>
    %43 = vector.shape_cast %42 : vector<1x8x1xf32> to vector<8x1xf32>
    %44 = vector.broadcast %43 : vector<8x1xf32> to vector<8x128xf32>
    %45 = arith.mulf %9, %44 : vector<8x128xf32>
    %c0_31 = arith.constant 0 : index
    %c0_32 = arith.constant 0 : index
    %46 = vector.load %arg9[%c0_31, %c0_32] : memref<128x384xf32, #tpu.memory_space<vmem>>, vector<128x384xf32>
    %cst_33 = arith.constant dense<0.000000e+00> : vector<8x384xf32>
    %47 = tpu.matmul %40, %46, %cst_33 {dimension_numbers = #tpu.dot_dimension_numbers<[1], [0], [0], [1], [0, 0, 1, 1], [], []>} : vector<8x128xf32>, vector<128x384xf32>, vector<8x384xf32> -> vector<8x384xf32>
    %c0_34 = arith.constant 0 : index
    %c0_35 = arith.constant 0 : index
    %48 = vector.load %arg10[%c0_34, %c0_35] : memref<128x384xf32, #tpu.memory_space<vmem>>, vector<128x384xf32>
    %cst_36 = arith.constant dense<0.000000e+00> : vector<8x384xf32>
    %49 = tpu.matmul %45, %48, %cst_36 {dimension_numbers = #tpu.dot_dimension_numbers<[1], [0], [0], [1], [0, 0, 1, 1], [], []>} : vector<8x128xf32>, vector<128x384xf32>, vector<8x384xf32> -> vector<8x384xf32>
    %50 = vector.extract_strided_slice %47 {offsets = [0, 0], sizes = [8, 256], strides = [1, 1]} : vector<8x384xf32> to vector<8x256xf32>
    %51 = vector.extract_strided_slice %49 {offsets = [0, 0], sizes = [8, 256], strides = [1, 1]} : vector<8x384xf32> to vector<8x256xf32>
    %52 = arith.addf %50, %51 : vector<8x256xf32>
    %53 = vector.broadcast %5 : vector<1x256xf32> to vector<8x256xf32>
    %54 = arith.addf %52, %53 : vector<8x256xf32>
    %55 = arith.negf %54 : vector<8x256xf32>
    %56 = math.exp %55 : vector<8x256xf32>
    %cst_37 = arith.constant 1.000000e+00 : f32
    %57 = vector.broadcast %cst_37 : f32 to vector<8x256xf32>
    %58 = arith.addf %57, %56 : vector<8x256xf32>
    %59 = arith.divf %57, %58 : vector<8x256xf32>
    %60 = vector.extract_strided_slice %59 {offsets = [0, 0], sizes = [8, 128], strides = [1, 1]} : vector<8x256xf32> to vector<8x128xf32>
    %61 = vector.extract_strided_slice %59 {offsets = [0, 128], sizes = [8, 128], strides = [1, 1]} : vector<8x256xf32> to vector<8x128xf32>
    %62 = vector.extract_strided_slice %47 {offsets = [0, 256], sizes = [8, 128], strides = [1, 1]} : vector<8x384xf32> to vector<8x128xf32>
    %63 = vector.broadcast %6 : vector<1x128xf32> to vector<8x128xf32>
    %64 = arith.addf %62, %63 : vector<8x128xf32>
    %65 = vector.extract_strided_slice %49 {offsets = [0, 256], sizes = [8, 128], strides = [1, 1]} : vector<8x384xf32> to vector<8x128xf32>
    %66 = vector.broadcast %7 : vector<1x128xf32> to vector<8x128xf32>
    %67 = arith.addf %65, %66 : vector<8x128xf32>
    %68 = arith.mulf %60, %67 : vector<8x128xf32>
    %69 = arith.addf %64, %68 : vector<8x128xf32>
    %70 = math.tanh %69 : vector<8x128xf32>
    %cst_38 = arith.constant 1.000000e+00 : f32
    %71 = vector.broadcast %cst_38 : f32 to vector<8x128xf32>
    %72 = arith.subf %71, %61 : vector<8x128xf32>
    %73 = arith.mulf %72, %70 : vector<8x128xf32>
    %74 = arith.mulf %61, %45 : vector<8x128xf32>
    %75 = arith.addf %73, %74 : vector<8x128xf32>
    %cst_39 = arith.constant dense<0.000000e+00> : vector<8xf32>
    %76 = vector.multi_reduction <add>, %75, %cst_39 [1] : vector<8x128xf32> to vector<8xf32>
    %77 = vector.shape_cast %76 : vector<8xf32> to vector<8x1xf32>
    %cst_40 = arith.constant 3.125000e-02 : f32
    %78 = vector.broadcast %cst_40 : f32 to vector<8x1xf32>
    %79 = arith.mulf %77, %78 : vector<8x1xf32>
    %80 = arith.mulf %75, %75 : vector<8x128xf32>
    %cst_41 = arith.constant dense<0.000000e+00> : vector<8xf32>
    %81 = vector.multi_reduction <add>, %80, %cst_41 [1] : vector<8x128xf32> to vector<8xf32>
    %82 = vector.shape_cast %81 : vector<8xf32> to vector<8x1xf32>
    %cst_42 = arith.constant 3.125000e-02 : f32
    %83 = vector.broadcast %cst_42 : f32 to vector<8x1xf32>
    %84 = arith.mulf %82, %83 : vector<8x1xf32>
    %85 = vector.broadcast %79 : vector<8x1xf32> to vector<8x128xf32>
    %86 = arith.subf %75, %85 : vector<8x128xf32>
    %87 = arith.mulf %79, %79 : vector<8x1xf32>
    %88 = arith.subf %84, %87 : vector<8x1xf32>
    %cst_43 = arith.constant 9.99999974E-6 : f32
    %89 = vector.broadcast %cst_43 : f32 to vector<8x1xf32>
    %90 = arith.addf %88, %89 : vector<8x1xf32>
    %91 = math.rsqrt %90 : vector<8x1xf32>
    %92 = vector.broadcast %91 : vector<8x1xf32> to vector<8x128xf32>
    %93 = arith.mulf %86, %92 : vector<8x128xf32>
    %c0_44 = arith.constant 0 : index
    %c0_45 = arith.constant 0 : index
    %94 = vector.load %arg14[%c0_44, %c0_45] : memref<128x128xf32, #tpu.memory_space<vmem>>, vector<128x128xf32>
    %cst_46 = arith.constant dense<0.000000e+00> : vector<8x128xf32>
    %95 = tpu.matmul %93, %94, %cst_46 {dimension_numbers = #tpu.dot_dimension_numbers<[1], [0], [0], [1], [0, 0, 1, 1], [], []>} : vector<8x128xf32>, vector<128x128xf32>, vector<8x128xf32> -> vector<8x128xf32>
    %96 = vector.broadcast %8 : vector<1x128xf32> to vector<8x128xf32>
    %97 = arith.addf %95, %96 : vector<8x128xf32>
    %98 = arith.index_cast %c0_i32_14 : i32 to index
    %c0_47 = arith.constant 0 : index
    %c0_48 = arith.constant 0 : index
    %99 = vector.load %arg16[%98, %c0_47, %c0_48] : memref<1x8x128xf32, #tpu.memory_space<vmem>>, vector<1x8x128xf32>
    %100 = vector.shape_cast %99 : vector<1x8x128xf32> to vector<8x128xf32>
    %101 = vector.shape_cast %97 : vector<8x128xf32> to vector<1x8x128xf32>
    tpu.vector_store %arg16[%98, %c0_47, %c0_48], %101 {strides = array<i32>} : memref<1x8x128xf32, #tpu.memory_space<vmem>>, vector<1x8x128xf32>,
    %c1_i32 = arith.constant 1 : i32
    %c0_49 = arith.constant 0 : index
    %c0_50 = arith.constant 0 : index
    %102 = vector.load %arg18[%c0_49, %c0_50] : memref<8x128xf32, #tpu.memory_space<vmem>>, vector<8x128xf32>
    tpu.vector_store %arg18[%c0_49, %c0_50], %75 {strides = array<i32>} : memref<8x128xf32, #tpu.memory_space<vmem>>, vector<8x128xf32>,
    %c0_51 = arith.constant 0 : index
    %c0_52 = arith.constant 0 : index
    %103 = vector.load %arg17[%c0_51, %c0_52] : memref<8x128xf32, #tpu.memory_space<vmem>>, vector<8x128xf32>
    tpu.vector_store %arg17[%c0_51, %c0_52], %75 {strides = array<i32>} : memref<8x128xf32, #tpu.memory_space<vmem>>, vector<8x128xf32>,
    return
  }
  func.func @transform_0(%arg0: i32, %arg1: i32) -> (i32, i32, i32) {
    %c0_i32 = arith.constant 0 : i32
    %c0_i32_0 = arith.constant 0 : i32
    return %arg1, %arg0, %c0_i32 : i32, i32, i32
  }
  func.func @transform_1(%arg0: i32, %arg1: i32) -> (i32, i32) {
    %c0_i32 = arith.constant 0 : i32
    %c0_i32_0 = arith.constant 0 : i32
    return %arg0, %c0_i32 : i32, i32
  }
  func.func @transform_2(%arg0: i32, %arg1: i32) -> (i32, i32, i32) {
    %c0_i32 = arith.constant 0 : i32
    %c0_i32_0 = arith.constant 0 : i32
    return %arg1, %arg0, %c0_i32 : i32, i32, i32
  }
  func.func @transform_3(%arg0: i32, %arg1: i32) -> (i32, i32) {
    %c0_i32 = arith.constant 0 : i32
    %c0_i32_0 = arith.constant 0 : i32
    %c0_i32_1 = arith.constant 0 : i32
    return %c0_i32, %c0_i32_0 : i32, i32
  }
  func.func @transform_4(%arg0: i32, %arg1: i32) -> (i32, i32) {
    %c0_i32 = arith.constant 0 : i32
    %c0_i32_0 = arith.constant 0 : i32
    %c0_i32_1 = arith.constant 0 : i32
    return %c0_i32, %c0_i32_0 : i32, i32
  }
  func.func @transform_5(%arg0: i32, %arg1: i32) -> (i32, i32) {
    %c0_i32 = arith.constant 0 : i32
    %c0_i32_0 = arith.constant 0 : i32
    %c0_i32_1 = arith.constant 0 : i32
    return %c0_i32, %c0_i32_0 : i32, i32
  }
  func.func @transform_6(%arg0: i32, %arg1: i32) -> (i32, i32) {
    %c0_i32 = arith.constant 0 : i32
    %c0_i32_0 = arith.constant 0 : i32
    %c0_i32_1 = arith.constant 0 : i32
    return %c0_i32, %c0_i32_0 : i32, i32
  }
  func.func @transform_7(%arg0: i32, %arg1: i32) -> (i32, i32) {
    %c0_i32 = arith.constant 0 : i32
    %c0_i32_0 = arith.constant 0 : i32
    %c0_i32_1 = arith.constant 0 : i32
    return %c0_i32, %c0_i32_0 : i32, i32
  }
  func.func @transform_8(%arg0: i32, %arg1: i32) -> (i32, i32) {
    %c0_i32 = arith.constant 0 : i32
    %c0_i32_0 = arith.constant 0 : i32
    %c0_i32_1 = arith.constant 0 : i32
    return %c0_i32, %c0_i32_0 : i32, i32
  }
  func.func @transform_9(%arg0: i32, %arg1: i32) -> (i32, i32) {
    %c0_i32 = arith.constant 0 : i32
    %c0_i32_0 = arith.constant 0 : i32
    %c0_i32_1 = arith.constant 0 : i32
    return %c0_i32, %c0_i32_0 : i32, i32
  }
  func.func @transform_10(%arg0: i32, %arg1: i32) -> (i32, i32) {
    %c0_i32 = arith.constant 0 : i32
    %c0_i32_0 = arith.constant 0 : i32
    %c0_i32_1 = arith.constant 0 : i32
    return %c0_i32, %c0_i32_0 : i32, i32
  }
  func.func @transform_11(%arg0: i32, %arg1: i32) -> (i32, i32) {
    %c0_i32 = arith.constant 0 : i32
    %c0_i32_0 = arith.constant 0 : i32
    %c0_i32_1 = arith.constant 0 : i32
    return %c0_i32, %c0_i32_0 : i32, i32
  }
  func.func @transform_12(%arg0: i32, %arg1: i32) -> (i32, i32) {
    %c0_i32 = arith.constant 0 : i32
    %c0_i32_0 = arith.constant 0 : i32
    %c0_i32_1 = arith.constant 0 : i32
    return %c0_i32, %c0_i32_0 : i32, i32
  }
  func.func @transform_13(%arg0: i32, %arg1: i32) -> (i32, i32) {
    %c0_i32 = arith.constant 0 : i32
    %c0_i32_0 = arith.constant 0 : i32
    %c0_i32_1 = arith.constant 0 : i32
    return %c0_i32, %c0_i32_0 : i32, i32
  }
  func.func @transform_14(%arg0: i32, %arg1: i32) -> (i32, i32, i32) {
    %c0_i32 = arith.constant 0 : i32
    %c0_i32_0 = arith.constant 0 : i32
    return %arg1, %arg0, %c0_i32 : i32, i32, i32
  }
  func.func @transform_15(%arg0: i32, %arg1: i32) -> (i32, i32) {
    %c0_i32 = arith.constant 0 : i32
    %c0_i32_0 = arith.constant 0 : i32
    return %arg0, %c0_i32 : i32, i32
  }
}

module attributes {stable_mosaic.version = 11 : i64} {
  func.func @kernel(%arg0: i32, %arg1: i32, %arg2: memref<1x8x16xf32, #tpu.memory_space<vmem>>, %arg3: memref<8x128xf32, #tpu.memory_space<vmem>>, %arg4: memref<1x8x1xf32, #tpu.memory_space<vmem>>, %arg5: memref<16x128xf32, #tpu.memory_space<vmem>>, %arg6: memref<1x128xf32, #tpu.memory_space<vmem>>, %arg7: memref<128x128xf32, #tpu.memory_space<vmem>>, %arg8: memref<1x128xf32, #tpu.memory_space<vmem>>, %arg9: memref<128x384xf32, #tpu.memory_space<vmem>>, %arg10: memref<128x384xf32, #tpu.memory_space<vmem>>, %arg11: memref<1x256xf32, #tpu.memory_space<vmem>>, %arg12: memref<1x128xf32, #tpu.memory_space<vmem>>, %arg13: memref<1x128xf32, #tpu.memory_space<vmem>>, %arg14: memref<128x128xf32, #tpu.memory_space<vmem>>, %arg15: memref<1x128xf32, #tpu.memory_space<vmem>>, %arg16: memref<1x8x128xf32, #tpu.memory_space<vmem>>, %arg17: memref<8x128xf32, #tpu.memory_space<vmem>>, %arg18: memref<8x128xf32, #tpu.memory_space<vmem>>) attributes {dimension_semantics = [#tpu.dimension_semantics<parallel>, #tpu.dimension_semantics<arbitrary>], iteration_bounds = array<i64: 1, 1>, scalar_prefetch = 0 : i64, scratch_operands = 1 : i64, tpu.core_type = #tpu.core_type<tc>, window_params = [{transform_indices = @transform_0, window_bounds = array<i64: 1, 8, 16>}, {transform_indices = @transform_1, window_bounds = array<i64: 8, 128>}, {transform_indices = @transform_2, window_bounds = array<i64: 1, 8, 1>}, {pipeline_mode = #tpu.pipeline_mode<synchronous>, transform_indices = @transform_3, window_bounds = array<i64: 16, 128>}, {pipeline_mode = #tpu.pipeline_mode<synchronous>, transform_indices = @transform_4, window_bounds = array<i64: 1, 128>}, {pipeline_mode = #tpu.pipeline_mode<synchronous>, transform_indices = @transform_5, window_bounds = array<i64: 128, 128>}, {pipeline_mode = #tpu.pipeline_mode<synchronous>, transform_indices = @transform_6, window_bounds = array<i64: 1, 128>}, {pipeline_mode = #tpu.pipeline_mode<synchronous>, transform_indices = @transform_7, window_bounds = array<i64: 128, 384>}, {pipeline_mode = #tpu.pipeline_mode<synchronous>, transform_indices = @transform_8, window_bounds = array<i64: 128, 384>}, {pipeline_mode = #tpu.pipeline_mode<synchronous>, transform_indices = @transform_9, window_bounds = array<i64: 1, 256>}, {pipeline_mode = #tpu.pipeline_mode<synchronous>, transform_indices = @transform_10, window_bounds = array<i64: 1, 128>}, {pipeline_mode = #tpu.pipeline_mode<synchronous>, transform_indices = @transform_11, window_bounds = array<i64: 1, 128>}, {pipeline_mode = #tpu.pipeline_mode<synchronous>, transform_indices = @transform_12, window_bounds = array<i64: 128, 128>}, {pipeline_mode = #tpu.pipeline_mode<synchronous>, transform_indices = @transform_13, window_bounds = array<i64: 1, 128>}, {transform_indices = @transform_14, window_bounds = array<i64: 1, 8, 128>}, {transform_indices = @transform_15, window_bounds = array<i64: 8, 128>}]} {
    %c0_i32 = arith.constant 0 : i32
    %0 = arith.cmpi eq, %arg1, %c0_i32 : i32
    %1 = arith.extui %0 : i1 to i32
    %c0_i32_0 = arith.constant 0 : i32
    %2 = arith.cmpi ne, %1, %c0_i32_0 : i32
    scf.if %2 {
      %c0_53 = arith.constant 0 : index
      %c0_54 = arith.constant 0 : index
      %104 = vector.load %arg3[%c0_53, %c0_54] : memref<8x128xf32, #tpu.memory_space<vmem>>, vector<8x128xf32>
      %c0_55 = arith.constant 0 : index
      %c0_56 = arith.constant 0 : index
      %105 = vector.load %arg18[%c0_55, %c0_56] : memref<8x128xf32, #tpu.memory_space<vmem>>, vector<8x128xf32>
      tpu.vector_store %arg18[%c0_55, %c0_56], %104 {strides = array<i32>} : memref<8x128xf32, #tpu.memory_space<vmem>>, vector<8x128xf32>,
    } else {
    }
    %c0 = arith.constant 0 : index
    %c0_1 = arith.constant 0 : index
    %3 = vector.load %arg6[%c0, %c0_1] : memref<1x128xf32, #tpu.memory_space<vmem>>, vector<1x128xf32>
    %c0_2 = arith.constant 0 : index
    %c0_3 = arith.constant 0 : index
    %4 = vector.load %arg8[%c0_2, %c0_3] : memref<1x128xf32, #tpu.memory_space<vmem>>, vector<1x128xf32>
    %c0_4 = arith.constant 0 : index
    %c0_5 = arith.constant 0 : index
    %5 = vector.load %arg11[%c0_4, %c0_5] : memref<1x256xf32, #tpu.memory_space<vmem>>, vector<1x256xf32>
    %c0_6 = arith.constant 0 : index
    %c0_7 = arith.constant 0 : index
    %6 = vector.load %arg12[%c0_6, %c0_7] : memref<1x128xf32, #tpu.memory_space<vmem>>, vector<1x128xf32>
    %c0_8 = arith.constant 0 : index
    %c0_9 = arith.constant 0 : index
    %7 = vector.load %arg13[%c0_8, %c0_9] : memref<1x128xf32, #tpu.memory_space<vmem>>, vector<1x128xf32>
    %c0_10 = arith.constant 0 : index
    %c0_11 = arith.constant 0 : index
    %8 = vector.load %arg15[%c0_10, %c0_11] : memref<1x128xf32, #tpu.memory_space<vmem>>, vector<1x128xf32>
    %c0_12 = arith.constant 0 : index
    %c0_13 = arith.constant 0 : index
    %9 = vector.load %arg18[%c0_12, %c0_13] : memref<8x128xf32, #tpu.memory_space<vmem>>, vector<8x128xf32>
    %c0_i32_14 = arith.constant 0 : i32
    %10 = arith.index_cast %c0_i32_14 : i32 to index
    %c0_15 = arith.constant 0 : index
    %c0_16 = arith.constant 0 : index
    %11 = vector.load %arg2[%10, %c0_15, %c0_16] : memref<1x8x16xf32, #tpu.memory_space<vmem>>, vector<1x8x16xf32>
    %12 = vector.shape_cast %11 : vector<1x8x16xf32> to vector<8x16xf32>
    %cst = arith.constant dense<0.000000e+00> : vector<8xf32>
    %13 = vector.multi_reduction <add>, %12, %cst [1] : vector<8x16xf32> to vector<8xf32>
    %14 = vector.shape_cast %13 : vector<8xf32> to vector<8x1xf32>
    %cst_17 = arith.constant 1.600000e+01 : f32
    %15 = vector.broadcast %cst_17 : f32 to vector<8x1xf32>
    %16 = arith.divf %14, %15 : vector<8x1xf32>
    %17 = vector.broadcast %16 : vector<8x1xf32> to vector<8x16xf32>
    %18 = arith.subf %12, %17 : vector<8x16xf32>
    %19 = arith.mulf %18, %18 : vector<8x16xf32>
    %cst_18 = arith.constant dense<0.000000e+00> : vector<8xf32>
    %20 = vector.multi_reduction <add>, %19, %cst_18 [1] : vector<8x16xf32> to vector<8xf32>
    %21 = vector.shape_cast %20 : vector<8xf32> to vector<8x1xf32>
    %cst_19 = arith.constant 1.600000e+01 : f32
    %22 = vector.broadcast %cst_19 : f32 to vector<8x1xf32>
    %23 = arith.divf %21, %22 : vector<8x1xf32>
    %cst_20 = arith.constant 9.99999974E-6 : f32
    %24 = vector.broadcast %cst_20 : f32 to vector<8x1xf32>
    %25 = arith.addf %23, %24 : vector<8x1xf32>
    %26 = math.rsqrt %25 : vector<8x1xf32>
    %27 = vector.broadcast %26 : vector<8x1xf32> to vector<8x16xf32>
    %28 = arith.mulf %18, %27 : vector<8x16xf32>
    %c0_21 = arith.constant 0 : index
    %c0_22 = arith.constant 0 : index
    %29 = vector.load %arg5[%c0_21, %c0_22] : memref<16x128xf32, #tpu.memory_space<vmem>>, vector<16x128xf32>
    %cst_23 = arith.constant dense<0.000000e+00> : vector<8x128xf32>
    %30 = tpu.matmul %28, %29, %cst_23 {dimension_numbers = #tpu.dot_dimension_numbers<[1], [0], [0], [1], [0, 0, 1, 1], [], []>} : vector<8x16xf32>, vector<16x128xf32>, vector<8x128xf32> -> vector<8x128xf32>
    %31 = vector.broadcast %3 : vector<1x128xf32> to vector<8x128xf32>
    %32 = arith.addf %30, %31 : vector<8x128xf32>
    %cst_24 = arith.constant 0.000000e+00 : f32
    %33 = vector.broadcast %cst_24 : f32 to vector<8x128xf32>
    %34 = arith.maximumf %32, %33 : vector<8x128xf32>
    %c0_25 = arith.constant 0 : index
    %c0_26 = arith.constant 0 : index
    %35 = vector.load %arg7[%c0_25, %c0_26] : memref<128x128xf32, #tpu.memory_space<vmem>>, vector<128x128xf32>
    %cst_27 = arith.constant dense<0.000000e+00> : vector<8x128xf32>
    %36 = tpu.matmul %34, %35, %cst_27 {dimension_numbers = #tpu.dot_dimension_numbers<[1], [0], [0], [1], [0, 0, 1, 1], [], []>} : vector<8x128xf32>, vector<128x128xf32>, vector<8x128xf32> -> vector<8x128xf32>
    %37 = vector.broadcast %4 : vector<1x128xf32> to vector<8x128xf32>
    %38 = arith.addf %36, %37 : vector<8x128xf32>
    %cst_28 = arith.constant 0.000000e+00 : f32
    %39 = vector.broadcast %cst_28 : f32 to vector<8x128xf32>
    %40 = arith.maximumf %38, %39 : vector<8x128xf32>
    %41 = arith.index_cast %c0_i32_14 : i32 to index
    %c0_29 = arith.constant 0 : index
    %c0_30 = arith.constant 0 : index
    %42 = vector.load %arg4[%41, %c0_29, %c0_30] : memref<1x8x1xf32, #tpu.memory_space<vmem>>, vector<1x8x1xf32>
    %43 = vector.shape_cast %42 : vector<1x8x1xf32> to vector<8x1xf32>
    %44 = vector.broadcast %43 : vector<8x1xf32> to vector<8x128xf32>
    %45 = arith.mulf %9, %44 : vector<8x128xf32>
    %c0_31 = arith.constant 0 : index
    %c0_32 = arith.constant 0 : index
    %46 = vector.load %arg9[%c0_31, %c0_32] : memref<128x384xf32, #tpu.memory_space<vmem>>, vector<128x384xf32>
    %cst_33 = arith.constant dense<0.000000e+00> : vector<8x384xf32>
    %47 = tpu.matmul %40, %46, %cst_33 {dimension_numbers = #tpu.dot_dimension_numbers<[1], [0], [0], [1], [0, 0, 1, 1], [], []>} : vector<8x128xf32>, vector<128x384xf32>, vector<8x384xf32> -> vector<8x384xf32>
    %c0_34 = arith.constant 0 : index
    %c0_35 = arith.constant 0 : index
    %48 = vector.load %arg10[%c0_34, %c0_35] : memref<128x384xf32, #tpu.memory_space<vmem>>, vector<128x384xf32>
    %cst_36 = arith.constant dense<0.000000e+00> : vector<8x384xf32>
    %49 = tpu.matmul %45, %48, %cst_36 {dimension_numbers = #tpu.dot_dimension_numbers<[1], [0], [0], [1], [0, 0, 1, 1], [], []>} : vector<8x128xf32>, vector<128x384xf32>, vector<8x384xf32> -> vector<8x384xf32>
    %50 = vector.extract_strided_slice %47 {offsets = [0, 0], sizes = [8, 256], strides = [1, 1]} : vector<8x384xf32> to vector<8x256xf32>
    %51 = vector.extract_strided_slice %49 {offsets = [0, 0], sizes = [8, 256], strides = [1, 1]} : vector<8x384xf32> to vector<8x256xf32>
    %52 = arith.addf %50, %51 : vector<8x256xf32>
    %53 = vector.broadcast %5 : vector<1x256xf32> to vector<8x256xf32>
    %54 = arith.addf %52, %53 : vector<8x256xf32>
    %55 = arith.negf %54 : vector<8x256xf32>
    %56 = math.exp %55 : vector<8x256xf32>
    %cst_37 = arith.constant 1.000000e+00 : f32
    %57 = vector.broadcast %cst_37 : f32 to vector<8x256xf32>
    %58 = arith.addf %57, %56 : vector<8x256xf32>
    %59 = arith.divf %57, %58 : vector<8x256xf32>
    %60 = vector.extract_strided_slice %59 {offsets = [0, 0], sizes = [8, 128], strides = [1, 1]} : vector<8x256xf32> to vector<8x128xf32>
    %61 = vector.extract_strided_slice %59 {offsets = [0, 128], sizes = [8, 128], strides = [1, 1]} : vector<8x256xf32> to vector<8x128xf32>
    %62 = vector.extract_strided_slice %47 {offsets = [0, 256], sizes = [8, 128], strides = [1, 1]} : vector<8x384xf32> to vector<8x128xf32>
    %63 = vector.broadcast %6 : vector<1x128xf32> to vector<8x128xf32>
    %64 = arith.addf %62, %63 : vector<8x128xf32>
    %65 = vector.extract_strided_slice %49 {offsets = [0, 256], sizes = [8, 128], strides = [1, 1]} : vector<8x384xf32> to vector<8x128xf32>
    %66 = vector.broadcast %7 : vector<1x128xf32> to vector<8x128xf32>
    %67 = arith.addf %65, %66 : vector<8x128xf32>
    %68 = arith.mulf %60, %67 : vector<8x128xf32>
    %69 = arith.addf %64, %68 : vector<8x128xf32>
    %70 = math.tanh %69 : vector<8x128xf32>
    %cst_38 = arith.constant 1.000000e+00 : f32
    %71 = vector.broadcast %cst_38 : f32 to vector<8x128xf32>
    %72 = arith.subf %71, %61 : vector<8x128xf32>
    %73 = arith.mulf %72, %70 : vector<8x128xf32>
    %74 = arith.mulf %61, %45 : vector<8x128xf32>
    %75 = arith.addf %73, %74 : vector<8x128xf32>
    %cst_39 = arith.constant dense<0.000000e+00> : vector<8xf32>
    %76 = vector.multi_reduction <add>, %75, %cst_39 [1] : vector<8x128xf32> to vector<8xf32>
    %77 = vector.shape_cast %76 : vector<8xf32> to vector<8x1xf32>
    %cst_40 = arith.constant 3.125000e-02 : f32
    %78 = vector.broadcast %cst_40 : f32 to vector<8x1xf32>
    %79 = arith.mulf %77, %78 : vector<8x1xf32>
    %80 = arith.mulf %75, %75 : vector<8x128xf32>
    %cst_41 = arith.constant dense<0.000000e+00> : vector<8xf32>
    %81 = vector.multi_reduction <add>, %80, %cst_41 [1] : vector<8x128xf32> to vector<8xf32>
    %82 = vector.shape_cast %81 : vector<8xf32> to vector<8x1xf32>
    %cst_42 = arith.constant 3.125000e-02 : f32
    %83 = vector.broadcast %cst_42 : f32 to vector<8x1xf32>
    %84 = arith.mulf %82, %83 : vector<8x1xf32>
    %85 = vector.broadcast %79 : vector<8x1xf32> to vector<8x128xf32>
    %86 = arith.subf %75, %85 : vector<8x128xf32>
    %87 = arith.mulf %79, %79 : vector<8x1xf32>
    %88 = arith.subf %84, %87 : vector<8x1xf32>
    %cst_43 = arith.constant 9.99999974E-6 : f32
    %89 = vector.broadcast %cst_43 : f32 to vector<8x1xf32>
    %90 = arith.addf %88, %89 : vector<8x1xf32>
    %91 = math.rsqrt %90 : vector<8x1xf32>
    %92 = vector.broadcast %91 : vector<8x1xf32> to vector<8x128xf32>
    %93 = arith.mulf %86, %92 : vector<8x128xf32>
    %c0_44 = arith.constant 0 : index
    %c0_45 = arith.constant 0 : index
    %94 = vector.load %arg14[%c0_44, %c0_45] : memref<128x128xf32, #tpu.memory_space<vmem>>, vector<128x128xf32>
    %cst_46 = arith.constant dense<0.000000e+00> : vector<8x128xf32>
    %95 = tpu.matmul %93, %94, %cst_46 {dimension_numbers = #tpu.dot_dimension_numbers<[1], [0], [0], [1], [0, 0, 1, 1], [], []>} : vector<8x128xf32>, vector<128x128xf32>, vector<8x128xf32> -> vector<8x128xf32>
    %96 = vector.broadcast %8 : vector<1x128xf32> to vector<8x128xf32>
    %97 = arith.addf %95, %96 : vector<8x128xf32>
    %98 = arith.index_cast %c0_i32_14 : i32 to index
    %c0_47 = arith.constant 0 : index
    %c0_48 = arith.constant 0 : index
    %99 = vector.load %arg16[%98, %c0_47, %c0_48] : memref<1x8x128xf32, #tpu.memory_space<vmem>>, vector<1x8x128xf32>
    %100 = vector.shape_cast %99 : vector<1x8x128xf32> to vector<8x128xf32>
    %101 = vector.shape_cast %97 : vector<8x128xf32> to vector<1x8x128xf32>
    tpu.vector_store %arg16[%98, %c0_47, %c0_48], %101 {strides = array<i32>} : memref<1x8x128xf32, #tpu.memory_space<vmem>>, vector<1x8x128xf32>,
    %c1_i32 = arith.constant 1 : i32
    %c0_49 = arith.constant 0 : index
    %c0_50 = arith.constant 0 : index
    %102 = vector.load %arg18[%c0_49, %c0_50] : memref<8x128xf32, #tpu.memory_space<vmem>>, vector<8x128xf32>
    tpu.vector_store %arg18[%c0_49, %c0_50], %75 {strides = array<i32>} : memref<8x128xf32, #tpu.memory_space<vmem>>, vector<8x128xf32>,
    %c0_51 = arith.constant 0 : index
    %c0_52 = arith.constant 0 : index
    %103 = vector.load %arg17[%c0_51, %c0_52] : memref<8x128xf32, #tpu.memory_space<vmem>>, vector<8x128xf32>
    tpu.vector_store %arg17[%c0_51, %c0_52], %75 {strides = array<i32>} : memref<8x128xf32, #tpu.memory_space<vmem>>, vector<8x128xf32>,
    return
  }
  func.func @transform_0(%arg0: i32, %arg1: i32) -> (i32, i32, i32) {
    %c0_i32 = arith.constant 0 : i32
    %c0_i32_0 = arith.constant 0 : i32
    return %arg1, %arg0, %c0_i32 : i32, i32, i32
  }
  func.func @transform_1(%arg0: i32, %arg1: i32) -> (i32, i32) {
    %c0_i32 = arith.constant 0 : i32
    %c0_i32_0 = arith.constant 0 : i32
    return %arg0, %c0_i32 : i32, i32
  }
  func.func @transform_2(%arg0: i32, %arg1: i32) -> (i32, i32, i32) {
    %c0_i32 = arith.constant 0 : i32
    %c0_i32_0 = arith.constant 0 : i32
    return %arg1, %arg0, %c0_i32 : i32, i32, i32
  }
  func.func @transform_3(%arg0: i32, %arg1: i32) -> (i32, i32) {
    %c0_i32 = arith.constant 0 : i32
    %c0_i32_0 = arith.constant 0 : i32
    %c0_i32_1 = arith.constant 0 : i32
    return %c0_i32, %c0_i32_0 : i32, i32
  }
  func.func @transform_4(%arg0: i32, %arg1: i32) -> (i32, i32) {
    %c0_i32 = arith.constant 0 : i32
    %c0_i32_0 = arith.constant 0 : i32
    %c0_i32_1 = arith.constant 0 : i32
    return %c0_i32, %c0_i32_0 : i32, i32
  }
  func.func @transform_5(%arg0: i32, %arg1: i32) -> (i32, i32) {
    %c0_i32 = arith.constant 0 : i32
    %c0_i32_0 = arith.constant 0 : i32
    %c0_i32_1 = arith.constant 0 : i32
    return %c0_i32, %c0_i32_0 : i32, i32
  }
  func.func @transform_6(%arg0: i32, %arg1: i32) -> (i32, i32) {
    %c0_i32 = arith.constant 0 : i32
    %c0_i32_0 = arith.constant 0 : i32
    %c0_i32_1 = arith.constant 0 : i32
    return %c0_i32, %c0_i32_0 : i32, i32
  }
  func.func @transform_7(%arg0: i32, %arg1: i32) -> (i32, i32) {
    %c0_i32 = arith.constant 0 : i32
    %c0_i32_0 = arith.constant 0 : i32
    %c0_i32_1 = arith.constant 0 : i32
    return %c0_i32, %c0_i32_0 : i32, i32
  }
  func.func @transform_8(%arg0: i32, %arg1: i32) -> (i32, i32) {
    %c0_i32 = arith.constant 0 : i32
    %c0_i32_0 = arith.constant 0 : i32
    %c0_i32_1 = arith.constant 0 : i32
    return %c0_i32, %c0_i32_0 : i32, i32
  }
  func.func @transform_9(%arg0: i32, %arg1: i32) -> (i32, i32) {
    %c0_i32 = arith.constant 0 : i32
    %c0_i32_0 = arith.constant 0 : i32
    %c0_i32_1 = arith.constant 0 : i32
    return %c0_i32, %c0_i32_0 : i32, i32
  }
  func.func @transform_10(%arg0: i32, %arg1: i32) -> (i32, i32) {
    %c0_i32 = arith.constant 0 : i32
    %c0_i32_0 = arith.constant 0 : i32
    %c0_i32_1 = arith.constant 0 : i32
    return %c0_i32, %c0_i32_0 : i32, i32
  }
  func.func @transform_11(%arg0: i32, %arg1: i32) -> (i32, i32) {
    %c0_i32 = arith.constant 0 : i32
    %c0_i32_0 = arith.constant 0 : i32
    %c0_i32_1 = arith.constant 0 : i32
    return %c0_i32, %c0_i32_0 : i32, i32
  }
  func.func @transform_12(%arg0: i32, %arg1: i32) -> (i32, i32) {
    %c0_i32 = arith.constant 0 : i32
    %c0_i32_0 = arith.constant 0 : i32
    %c0_i32_1 = arith.constant 0 : i32
    return %c0_i32, %c0_i32_0 : i32, i32
  }
  func.func @transform_13(%arg0: i32, %arg1: i32) -> (i32, i32) {
    %c0_i32 = arith.constant 0 : i32
    %c0_i32_0 = arith.constant 0 : i32
    %c0_i32_1 = arith.constant 0 : i32
    return %c0_i32, %c0_i32_0 : i32, i32
  }
  func.func @transform_14(%arg0: i32, %arg1: i32) -> (i32, i32, i32) {
    %c0_i32 = arith.constant 0 : i32
    %c0_i32_0 = arith.constant 0 : i32
    return %arg1, %arg0, %c0_i32 : i32, i32, i32
  }
  func.func @transform_15(%arg0: i32, %arg1: i32) -> (i32, i32) {
    %c0_i32 = arith.constant 0 : i32
    %c0_i32_0 = arith.constant 0 : i32
    return %arg0, %c0_i32 : i32, i32
  }
}

</mosaic_0001>

<bundles_post_ra>
// kernel: tpu_custom_call.1
= control target key start
LH: loop header
LB: loop body
LE: loop exit
PB: predicated region body
PF: predicated region fallthrough
CT: control target
= control target key end

     0   :  { %21 = vsyncpa [#allocation4], 0  ;;  %s1817_s0 = inlined_call_operand.hbm [shape: f32[1,8,16], index: 0, kind: input, shape index: {}]   ;;  %s1818_s1 = inlined_call_operand.hbm [shape: f32[8,128], index: 1, kind: input, shape index: {}]   ;;  %s1819_s2 = inlined_call_operand.vmem [shape: f32[1,8,1], index: 2, kind: input, shape index: {}]   ;;  %s1820_s3 = inlined_call_operand.vmem [shape: f32[16,128], index: 3, kind: input, shape index: {}]   ;;  %s1821_s4 = inlined_call_operand.vmem [shape: f32[1,128], index: 4, kind: input, shape index: {}]   ;;  %s1822_s5 = inlined_call_operand.hbm [shape: f32[128,128], index: 5, kind: input, shape index: {}]   ;;  %s1823_s6 = inlined_call_operand.vmem [shape: f32[1,128], index: 6, kind: input, shape index: {}]   ;;  %s1824_s7 = inlined_call_operand.hbm [shape: f32[128,384], index: 7, kind: input, shape index: {}]   ;;  %s1825_s8 = inlined_call_operand.hbm [shape: f32[128,384], index: 8, kind: input, shape index: {}]   ;;  %s1826_s9 = inlined_call_operand.vmem [shape: f32[1,256], index: 9, kind: input, shape index: {}]   ;;  %s1827_s10 = inlined_call_operand.vmem [shape: f32[1,128], index: 10, kind: input, shape index: {}]   ;;  %s1828_s11 = inlined_call_operand.vmem [shape: f32[1,128], index: 11, kind: input, shape index: {}]   ;;  %s1829_s12 = inlined_call_operand.hbm [shape: f32[128,128], index: 12, kind: input, shape index: {}]   ;;  %s1830_s13 = inlined_call_operand.vmem [shape: f32[1,128], index: 13, kind: input, shape index: {}]   ;;  %s1831_s14 = inlined_call_operand.hbm [shape: f32[1,8,128], index: 14, kind: output, shape index: {0}]   ;;  %s1832_s15 = inlined_call_operand.hbm [shape: f32[8,128], index: 15, kind: output, shape index: {1}]  }
   0x1   :  { %22 = vsyncpa [#allocation7], 0 }
   0x2   :  { %23 = vsyncpa [#allocation10], 0 }
   0x3   :  { %24 = vsyncpa [#allocation13], 0 }
   0x4   :  { %25 = vsyncpa [#allocation5], 0 }
   0x5   :  { %26 = vsyncpa [#allocation16], 0  ;;  %s1517_s18 = smov [#allocation6]   ;;  %s1518_s20 = smov [#allocation9]  }
   0x6   :  { %s43_s19 = sshll.u32 %s1517_s18, 4  ;;  %s72_s21 = sshll.u32 %s1518_s20, 4  ;;  %s44_s19 = int_to_ptr.vmem [resolvable:$true] %s43_s19  ;;  %s1613_s21 = int_to_ptr.vmem [resolvable:$true] %s72_s21 }
   0x7   :  { %s1329_s24 = scalar_lea.hbm %s1818_s1, 128 }
   0x8   :  { %p1330_p0 = scmp.ne.s32.totalorder %s1818_s1, %s1329_s24  ;;  %p1333_p1 = scmp.lt.u32.totalorder %s1329_s24, %s1818_s1 }
   0xa   :  { %p1335_p2 = pnand %p1333_p1, %p1330_p0 }
   0xc   :  { %1338 = shalt.err (!%p1335_p2)
}
   0xd   :  { %s1339_s29 = scalar_lea.vmem %s44_s19, 128  ;;  %p1344_p4 = scmp.lt.s32.totalorder %s44_s19, %s44_s19 }
   0xe   :  { %p1340_p3 = scmp.ne.s32.totalorder %s44_s19, %s1339_s29  ;;  %p1345_p5 = scmp.lt.s32.totalorder %s1339_s29, %s1339_s29 }
  0x10   :  { %p1346_p6 = por %p1345_p5, %p1344_p4 }
  0x12   :  { %p1347_p7 = pnand %p1346_p6, %p1340_p3 }
  0x14   :  { %1350 = shalt.err (!%p1347_p7)
}
  0x15   :  { %46 = dma.hbm_to_vmem [thread:$0]  %s1818_s1, 128, %s44_s19, [#allocation7]  }
  0x16   :  { %s1351_s20 = scalar_lea.hbm %s1824_s7, 6144 }
  0x17   :  { %p1352_p8 = scmp.ne.s32.totalorder %s1824_s7, %s1351_s20  ;;  %p1355_p9 = scmp.lt.u32.totalorder %s1351_s20, %s1824_s7 }
  0x19   :  { %p1357_p10 = pnand %p1355_p9, %p1352_p8 }
  0x1b   :  { %1360 = shalt.err (!%p1357_p10)
}
  0x1c   :  { %s1361_s26 = scalar_lea.vmem %s1613_s21, 6144  ;;  %p1366_p12 = scmp.lt.s32.totalorder %s1613_s21, %s1613_s21 }
  0x1d   :  { %p1362_p11 = scmp.ne.s32.totalorder %s1613_s21, %s1361_s26  ;;  %p1367_p13 = scmp.lt.s32.totalorder %s1361_s26, %s1361_s26 }
  0x1f   :  { %p1368_p0 = por %p1367_p13, %p1366_p12 }
  0x21   :  { %p1369_p1 = pnand %p1368_p0, %p1362_p11 }
  0x23   :  { %1372 = shalt.err (!%p1369_p1)
}
  0x24   :  { %s1519_s1 = smov 384   ;;  %s1520_s19 = smov 24  }
  0x25   :  { %78 = dma.hbm_to_vmem [thread:$0]  %s1824_s7, 6144, %s1613_s21, [#allocation10], %s1519_s1, %s1519_s1, %s1520_s19  }
  0x26   :  { %s1521_s29 = smov [#allocation3]   ;;  %s1522_s16 = smov [#allocation8]  }
  0x27   :  { %s33_s30 = sshll.u32 %s1521_s29, 4  ;;  %s58_s17 = sshll.u32 %s1522_s16, 4  ;;  %s34_s30 = int_to_ptr.vmem [resolvable:$true] %s33_s30  ;;  %s1647_s17 = int_to_ptr.vmem [resolvable:$true] %s58_s17 }
  0x28   :  { %s1373_s22 = scalar_lea.hbm %s1817_s0, 128 }
  0x29   :  { %p1374_p2 = scmp.ne.s32.totalorder %s1817_s0, %s1373_s22  ;;  %p1377_p3 = scmp.lt.u32.totalorder %s1373_s22, %s1817_s0 }
  0x2b   :  { %p1379_p4 = pnand %p1377_p3, %p1374_p2 }
  0x2d   :  { %1382 = shalt.err (!%p1379_p4)
}
  0x2e   :  { %s1383_s7 = scalar_lea.vmem %s34_s30, 128  ;;  %p1388_p6 = scmp.lt.s32.totalorder %s34_s30, %s34_s30 }
  0x2f   :  { %p1384_p5 = scmp.ne.s32.totalorder %s34_s30, %s1383_s7  ;;  %p1389_p7 = scmp.lt.s32.totalorder %s1383_s7, %s1383_s7 }
  0x31   :  { %p1390_p8 = por %p1389_p7, %p1388_p6 }
  0x33   :  { %p1391_p9 = pnand %p1390_p8, %p1384_p5 }
  0x35   :  { %1394 = shalt.err (!%p1391_p9)
}
  0x36   :  { %36 = dma.hbm_to_vmem [thread:$0]  %s1817_s0, 128, %s34_s30, [#allocation4]  }
  0x37   :  { %s1395_s16 = scalar_lea.hbm %s1822_s5, 2048 }
  0x38   :  { %p1396_p10 = scmp.ne.s32.totalorder %s1822_s5, %s1395_s16  ;;  %p1399_p11 = scmp.lt.u32.totalorder %s1395_s16, %s1822_s5 }
  0x3a   :  { %p1401_p12 = pnand %p1399_p11, %p1396_p10 }
  0x3c   :  { %1404 = shalt.err (!%p1401_p12)
}
  0x3d   :  { %s1405_s24 = scalar_lea.vmem %s1647_s17, 2048  ;;  %p1410_p0 = scmp.lt.s32.totalorder %s1647_s17, %s1647_s17 }
  0x3e   :  { %p1406_p13 = scmp.ne.s32.totalorder %s1647_s17, %s1405_s24  ;;  %p1411_p1 = scmp.lt.s32.totalorder %s1405_s24, %s1405_s24 }
  0x40   :  { %p1412_p2 = por %p1411_p1, %p1410_p0 }
  0x42   :  { %p1413_p3 = pnand %p1412_p2, %p1406_p13 }
  0x44   :  { %1416 = shalt.err (!%p1413_p3)
}
  0x45   :  { %s1523_s0 = smov 128   ;;  %s1524_s30 = smov 8  }
  0x46   :  { %64 = dma.hbm_to_vmem [thread:$0]  %s1822_s5, 2048, %s1647_s17, [#allocation7], %s1523_s0, %s1523_s0, %s1524_s30  }
  0x47   :  { %s1525_s7 = smov [#allocation11]   ;;  %s1526_s27 = smov [#allocation12]  }
  0x48   :  { %s84_s21 = sshll.u32 %s1525_s7, 4  ;;  %s102_s28 = sshll.u32 %s1526_s27, 4  ;;  %s85_s21 = int_to_ptr.vmem [resolvable:$true] %s84_s21  ;;  %s1681_s28 = int_to_ptr.vmem [resolvable:$true] %s102_s28 }
  0x49   :  { %s1417_s18 = scalar_lea.hbm %s1825_s8, 6144 }
  0x4a   :  { %p1418_p4 = scmp.ne.s32.totalorder %s1825_s8, %s1417_s18  ;;  %p1421_p5 = scmp.lt.u32.totalorder %s1417_s18, %s1825_s8 }
  0x4c   :  { %p1423_p6 = pnand %p1421_p5, %p1418_p4 }
  0x4e   :  { %1426 = shalt.err (!%p1423_p6)
}
  0x4f   :  { %s1427_s5 = scalar_lea.vmem %s85_s21, 6144  ;;  %p1432_p8 = scmp.lt.s32.totalorder %s85_s21, %s85_s21 }
  0x50   :  { %p1428_p7 = scmp.ne.s32.totalorder %s85_s21, %s1427_s5  ;;  %p1433_p9 = scmp.lt.s32.totalorder %s1427_s5, %s1427_s5 }
  0x52   :  { %p1434_p10 = por %p1433_p9, %p1432_p8 }
  0x54   :  { %p1435_p11 = pnand %p1434_p10, %p1428_p7 }
  0x56   :  { %1438 = shalt.err (!%p1435_p11)
}
  0x57   :  { %90 = dma.hbm_to_vmem [thread:$0]  %s1825_s8, 6144, %s85_s21, [#allocation10], %s1519_s1, %s1519_s1, %s1520_s19  }
  0x58   :  { %s1439_s27 = scalar_lea.hbm %s1829_s12, 2048 }
  0x59   :  { %p1440_p12 = scmp.ne.s32.totalorder %s1829_s12, %s1439_s27  ;;  %p1443_p13 = scmp.lt.u32.totalorder %s1439_s27, %s1829_s12 }
  0x5b   :  { %p1445_p0 = pnand %p1443_p13, %p1440_p12 }
  0x5d   :  { %1448 = shalt.err (!%p1445_p0)
}
  0x5e   :  { %s1449_s22 = scalar_lea.vmem %s1681_s28, 2048  ;;  %p1454_p2 = scmp.lt.s32.totalorder %s1681_s28, %s1681_s28 }
  0x5f   :  { %p1450_p1 = scmp.ne.s32.totalorder %s1681_s28, %s1449_s22  ;;  %p1455_p3 = scmp.lt.s32.totalorder %s1449_s22, %s1449_s22 }
  0x61   :  { %p1456_p4 = por %p1455_p3, %p1454_p2 }
  0x63   :  { %p1457_p5 = pnand %p1456_p4, %p1450_p1 }
  0x65   :  { %1460 = shalt.err (!%p1457_p5)
}
  0x66   :  { %108 = dma.hbm_to_vmem [thread:$0]  %s1829_s12, 2048, %s1681_s28, [#allocation13], %s1523_s0, %s1523_s0, %s1524_s30  }
  0x67   :  { %1505 = dma.done.wait [#allocation4], 128  }
  0x68   :  { %1506 = vsyncadd [#allocation4], 4294967168 }
  0x69   :  { %1507 = dma.done.wait [#allocation7], 2176  }
  0x6a   :  { %1508 = vsyncadd [#allocation7], 4294965120 }
  0x6b   :  { %1509 = dma.done.wait [#allocation10], 12288  }
  0x6c   :  { %1510 = vsyncadd [#allocation10], 4294955008 }
  0x6d   :  { %1511 = dma.done.wait [#allocation13], 2048  }
  0x6e   :  { %1512 = vsyncadd [#allocation13], 4294965248  ;;  %vm143_vm0 = vcmask 130048   ;;  %v142_v0 = vld [vmem:[#allocation3] sm:$0xff]  ;;  %v159_v8 = vld [vmem:[%s1820_s3 + $0x8] sm:$0xff]  ;;  %v1527_v9 = vmov 0.0|0.0  }
  0x6f   :  { %v144_v1 = vsel %vm143_vm0, %v142_v0, 0.0  ;;  %v158_v7 = vld [vmem:[%s1820_s3] sm:$0xff]  ;;  %1132 = vmatprep.subr.bf16.mxu0 %v1527_v9  ;;  %vm1528_vm1 = vmmov 0   ;;  %v1529_v11 = vmov 0.0   ;;  %1135 = vmatprep.subr.bf16.mxu1 %v1527_v9  ;;  %v240_v12 = vld [vmem:[#allocation8] sm:$0xff]  ;;  %v241_v13 = vld [vmem:[#allocation8 + $0x8] sm:$0xff] }
  0x70   :  { %145 = vadd.xlane.f32.xlu0 %v144_v1  ;;  %v1133_v10 = vpack.c.bf16 %v159_v8, %v158_v7  ;;  %989 = vmatprep.mubr.msk.f32.mxu0 %vm1528_vm1, %v1529_v11  ;;  %v242_v14 = vld [vmem:[#allocation8 + $0x10] sm:$0xff]  ;;  %v1136_v15 = vpack.c.bf16 %v241_v13, %v240_v12  ;;  %v243_v16 = vld [vmem:[#allocation8 + $0x18] sm:$0xff]  ;;  %v244_v18 = vld [vmem:[#allocation8 + $0x20] sm:$0xff]  ;;  %v1530_v44 = vmov 0  }
  0x71   :  { %1024 = vmatprep.mubr.msk.f32.mxu1 %vm1528_vm1, %v1529_v11  ;;  %v1139_v17 = vpack.c.bf16 %v243_v16, %v242_v14  ;;  %v245_v19 = vld [vmem:[#allocation8 + $0x28] sm:$0xff]  ;;  %v246_v21 = vld [vmem:[#allocation8 + $0x30] sm:$0xff]  ;;  %v247_v22 = vld [vmem:[#allocation8 + $0x38] sm:$0xff]  ;;  %1313 = vset.pattern.permute.xlu1 %v1530_v44 }
  0x72   :  { %1134 = vmatpush3.bf16.msra.mxu0 %v1133_v10  ;;  %1137 = vmatpush3.bf16.msra.mxu1 %v1136_v15  ;;  %v1142_v20 = vpack.c.bf16 %v245_v19, %v244_v18  ;;  %v1145_v23 = vpack.c.bf16 %v247_v22, %v246_v21  ;;  %v248_v24 = vld [vmem:[#allocation8 + $0x40] sm:$0xff]  ;;  %v249_v25 = vld [vmem:[#allocation8 + $0x48] sm:$0xff]  ;;  %v250_v27 = vld [vmem:[#allocation8 + $0x50] sm:$0xff] }
  0x73   :  { %1138 = vmatprep.subr.bf16.mxu1 %v1527_v9  ;;  %v1148_v26 = vpack.c.bf16 %v249_v25, %v248_v24  ;;  %v251_v28 = vld [vmem:[#allocation8 + $0x58] sm:$0xff]  ;;  %v252_v30 = vld [vmem:[#allocation8 + $0x60] sm:$0xff]  ;;  %v253_v31 = vld [vmem:[#allocation8 + $0x68] sm:$0xff]  ;;  %1314 = vset.pattern.permute.xlu0 %v1530_v44 }
  0x74   :  { %v1151_v29 = vpack.c.bf16 %v251_v28, %v250_v27  ;;  %v1154_v32 = vpack.c.bf16 %v253_v31, %v252_v30  ;;  %v254_v38 = vld [vmem:[#allocation8 + $0x70] sm:$0xff]  ;;  %v255_v39 = vld [vmem:[#allocation8 + $0x78] sm:$0xff]  ;;  %v341_v42 = vld [vmem:[#allocation9 + $0x8] sm:$0xff] }
  0x75   :  { %v1157_v40 = vpack.c.bf16 %v255_v39, %v254_v38  ;;  %v333_v41 = vld [vmem:[%s1819_s2] sm:$0xff]  ;;  %v344_v43 = vld [vmem:[#allocation9 + $0x20] sm:$0xff]  ;;  %v343_v47 = vld [vmem:[#allocation9 + $0x18] sm:$0xff] }
  0x76   :  { %1140 = vmatpush3.bf16.msra.mxu1 %v1139_v17  ;;  %v1159_v45 = vpack.c.bf16 %v344_v43, %v341_v42  ;;  %v340_v46 = vld [vmem:[#allocation9] sm:$0xff]  ;;  %336 = vperm.xlu1 %1313, %v333_v41   ;;  %v347_v49 = vld [vmem:[#allocation9 + $0x38] sm:$0xff]  ;;  %v350_v50 = vld [vmem:[#allocation9 + $0x50] sm:$0xff] }
  0x77   :  { %1141 = vmatprep.subr.bf16.mxu1 %v1527_v9  ;;  %v1161_v48 = vpack.c.bf16 %v343_v47, %v340_v46  ;;  %v1163_v51 = vpack.c.bf16 %v350_v50, %v347_v49  ;;  %v346_v52 = vld [vmem:[#allocation9 + $0x30] sm:$0xff]  ;;  %v349_v53 = vld [vmem:[#allocation9 + $0x48] sm:$0xff]  ;;  %v356_v56 = vld [vmem:[#allocation9 + $0x80] sm:$0xff] }
  0x78   :  { %1160 = vmatprep.subr.bf16.mxu0 %v1159_v45  ;;  %v1165_v54 = vpack.c.bf16 %v349_v53, %v346_v52  ;;  %v353_v55 = vld [vmem:[#allocation9 + $0x68] sm:$0xff]  ;;  %v352_v58 = vld [vmem:[#allocation9 + $0x60] sm:$0xff]  ;;  %v355_v59 = vld [vmem:[#allocation9 + $0x78] sm:$0xff] }
  0x79   :  { %v1167_v57 = vpack.c.bf16 %v356_v56, %v353_v55  ;;  %v1169_v60 = vpack.c.bf16 %v355_v59, %v352_v58  ;;  %v359_v61 = vld [vmem:[#allocation9 + $0x98] sm:$0xff]  ;;  %v362_v62 = vld [vmem:[#allocation9 + $0xb0] sm:$0xff]  ;;  %v361_v1 = vld [vmem:[#allocation9 + $0xa8] sm:$0xff] }
  0x7a   :  { %1143 = vmatpush3.bf16.msra.mxu1 %v1142_v20  ;;  %v1171_v63 = vpack.c.bf16 %v362_v62, %v359_v61  ;;  %v367_v7 = vld [vmem:[#allocation9 + $0xd8] sm:$0xff]  ;;  %v374_v12 = vld [vmem:[#allocation9 + $0x110] sm:$0xff]  ;;  %v373_v15 = vld [vmem:[#allocation9 + $0x108] sm:$0xff] }
  0x7b   :  { %1144 = vmatprep.subr.bf16.mxu1 %v1527_v9  ;;  %v371_v10 = vld [vmem:[#allocation9 + $0xf8] sm:$0xff]  ;;  %v370_v14 = vld [vmem:[#allocation9 + $0xf0] sm:$0xff]  ;;  %v377_v17 = vld [vmem:[#allocation9 + $0x128] sm:$0xff] }
  0x7c   :  { %v1179_v13 = vpack.c.bf16 %v374_v12, %v371_v10  ;;  %v1181_v16 = vpack.c.bf16 %v373_v15, %v370_v14  ;;  %v380_v18 = vld [vmem:[#allocation9 + $0x140] sm:$0xff]  ;;  %v379_v21 = vld [vmem:[#allocation9 + $0x138] sm:$0xff]  ;;  %v342_v24 = vld [vmem:[#allocation9 + $0x10] sm:$0xff] }
  0x7d   :  { %v1183_v19 = vpack.c.bf16 %v380_v18, %v377_v17  ;;  %v376_v20 = vld [vmem:[#allocation9 + $0x120] sm:$0xff]  ;;  %v345_v25 = vld [vmem:[#allocation9 + $0x28] sm:$0xff]  ;;  %v363_v38 = vld [vmem:[#allocation9 + $0xb8] sm:$0xff] }
  0x7e   :  { %1146 = vmatpush3.bf16.msra.mxu1 %v1145_v23  ;;  %v1185_v22 = vpack.c.bf16 %v379_v21, %v376_v20  ;;  %v906_v23 = vld [vmem:[%s1821_s4] ss:$0 sm:$0xff]  ;;  %v348_v31 = vld [vmem:[#allocation9 + $0x40] sm:$0xff]  ;;  %v369_v41 = vld [vmem:[#allocation9 + $0xe8] sm:$0xff] }
  0x7f   :  { %1147 = vmatprep.subr.bf16.mxu1 %v1527_v9  ;;  %v372_v43 = vld [vmem:[#allocation9 + $0x100] sm:$0xff]  ;;  %v375_v44 = vld [vmem:[#allocation9 + $0x118] sm:$0xff]  ;;  %v378_v46 = vld [vmem:[#allocation9 + $0x130] sm:$0xff] }
  0x80   :  { %v1207_v45 = vpack.c.bf16 %v375_v44, %v372_v43  ;;  %v381_v47 = vld [vmem:[#allocation9 + $0x148] sm:$0xff]  ;;  %v383_v49 = vld [vmem:[#allocation9 + $0x158] sm:$0xff]  ;;  %v386_v50 = vld [vmem:[#allocation9 + $0x170] sm:$0xff] }
  0x81   :  { %v382_v52 = vld [vmem:[#allocation9 + $0x150] sm:$0xff]  ;;  %v385_v53 = vld [vmem:[#allocation9 + $0x168] sm:$0xff]  ;;  %v387_v56 = vld [vmem:[#allocation9 + $0x178] sm:$0xff] }
  0x82   :  { %1149 = vmatpush3.bf16.msra.mxu1 %v1148_v26  ;;  %v1189_v55 = vpack.c.bf16 %v385_v53, %v382_v52  ;;  %v530_v58 = vld [vmem:[#allocation11 + $0x8] sm:$0xff]  ;;  %v533_v59 = vld [vmem:[#allocation11 + $0x20] sm:$0xff]  ;;  %v908_v61 = vld [vmem:[%s1823_s6] ss:$0 sm:$0xff] }
  0x83   :  { %1150 = vmatprep.subr.bf16.mxu1 %v1527_v9  ;;  %v529_v62 = vld [vmem:[#allocation11] sm:$0xff]  ;;  %v535_v10 = vld [vmem:[#allocation11 + $0x30] sm:$0xff]  ;;  %v538_v14 = vld [vmem:[#allocation11 + $0x48] sm:$0xff] }
  0x84   :  { %v537_v15 = vld [vmem:[#allocation11 + $0x40] sm:$0xff]  ;;  %v542_v17 = vld [vmem:[#allocation11 + $0x68] sm:$0xff]  ;;  %v560_v44 = vld [vmem:[#allocation11 + $0xf8] sm:$0xff] }
  0x85   :  { %v545_v18 = vld [vmem:[#allocation11 + $0x80] sm:$0xff]  ;;  %v558_v43 = vld [vmem:[#allocation11 + $0xe8] sm:$0xff]  ;;  %v564_v52 = vld [vmem:[#allocation11 + $0x118] sm:$0xff] }
  0x86   :  { %1152 = vmatpush3.bf16.msra.mxu1 %v1151_v29  ;;  %v1192_v29 = vpack.c.bf16 %v345_v25, %v342_v24  ;;  %v541_v21 = vld [vmem:[#allocation11 + $0x60] sm:$0xff]  ;;  %v543_v24 = vld [vmem:[#allocation11 + $0x70] sm:$0xff]  ;;  %v546_v25 = vld [vmem:[#allocation11 + $0x88] sm:$0xff] }
  0x87   :  { %1153 = vmatprep.subr.bf16.mxu1 %v1527_v9  ;;  %v566_v53 = vld [vmem:[#allocation11 + $0x128] sm:$0xff] }
  0x8a   :  { %1155 = vmatpush3.bf16.msra.mxu1 %v1154_v32  ;;  %v351_v32 = vld [vmem:[#allocation9 + $0x58] sm:$0xff] }
  0x8b   :  { %1156 = vmatprep.subr.bf16.mxu1 %v1527_v9 }
  0x8e   :  { %1158 = vmatpush3.bf16.msra.mxu1 %v1157_v40  ;;  %v366_v40 = vld [vmem:[#allocation9 + $0xd0] sm:$0xff] }
  0x8f   :  { %1191 = vmatprep.subr.bf16.mxu1 %v1527_v9  ;;  %v1204_v42 = vpack.c.bf16 %v369_v41, %v366_v40  ;;  %v556_v41 = vld [vmem:[#allocation11 + $0xd8] sm:$0xff] }
  0xfd   :  { %v146_v2 = vpop.xlane.xlu0 %145 }
  0xfe   :  { %v148_v3 = vmul.f32 0.0625, %v146_v2 }
 0x100   :  { %v149_v4 = vsub.f32 %v142_v0, %v148_v3  ;;  %v358_v0 = vld [vmem:[#allocation9 + $0x90] sm:$0xff]  ;;  %v365_v3 = vld [vmem:[#allocation9 + $0xc8] sm:$0xff] }
 0x101   :  { %v1173_v2 = vpack.c.bf16 %v361_v1, %v358_v0  ;;  %v531_v0 = vld [vmem:[#allocation11 + $0x10] sm:$0xff]  ;;  %v534_v1 = vld [vmem:[#allocation11 + $0x28] sm:$0xff] }
 0x102   :  { %v150_v5 = vmul.f32 %v149_v4, %v149_v4 }
 0x104   :  { %v151_v6 = vsel %vm143_vm0, %v150_v5, 0.0 }
 0x105   :  { %152 = vadd.xlane.f32.xlu0 %v151_v6  ;;  %v364_v6 = vld [vmem:[#allocation9 + $0xc0] sm:$0xff] }
 0x106   :  { %v1177_v8 = vpack.c.bf16 %v367_v7, %v364_v6 }
 0x192   :  { %v153_v33 = vpop.xlane.xlu0 %152 }
 0x193   :  { %v154_v34 = vmul.f32 0.0625, %v153_v33  ;;  %v1195_v33 = vpack.c.bf16 %v351_v32, %v348_v31  ;;  %v550_v32 = vld [vmem:[#allocation11 + $0xa8] sm:$0xff] }
 0x195   :  { %v155_v35 = vadd.f32 1e-05, %v154_v34  ;;  %v354_v34 = vld [vmem:[#allocation9 + $0x70] sm:$0xff] }
 0x197   :  { %1315 = vrsqrt.f32 %v155_v35  ;;  %v357_v35 = vld [vmem:[#allocation9 + $0x88] sm:$0xff] }
 0x1a1   :  { %v1316_v36 = vpop.eup %1315 }
 0x1a2   :  { %v157_v37 = vmul.f32 %v1316_v36, %v149_v4  ;;  %v368_v4 = vld [vmem:[#allocation9 + $0xe0] sm:$0xff]  ;;  %v1198_v36 = vpack.c.bf16 %v357_v35, %v354_v34  ;;  %v552_v34 = vld [vmem:[#allocation11 + $0xb8] sm:$0xff]  ;;  %v554_v35 = vld [vmem:[#allocation11 + $0xc8] sm:$0xff] }
 0x1a3   :  { %v1175_v5 = vpack.c.bf16 %v368_v4, %v365_v3  ;;  %v536_v3 = vld [vmem:[#allocation11 + $0x38] sm:$0xff]  ;;  %v539_v4 = vld [vmem:[#allocation11 + $0x50] sm:$0xff] }
 0x1a4   :  { %990 = vmatmul.mubr.msk.f32.vlgmr.msra.gmra.mrb[0].mxu0 %vm143_vm0, %v157_v37  ;;  %v360_v37 = vld [vmem:[#allocation9 + $0xa0] sm:$0xff] }
 0x1a5   :  { %452 = vmatprep.mubr.f32.mxu0 %v1529_v11  ;;  %1162 = vmatpush1.bf16.msra.mxu0 %v1161_v48  ;;  %v1201_v39 = vpack.c.bf16 %v363_v38, %v360_v37  ;;  %v1210_v48 = vpack.c.bf16 %v381_v47, %v378_v46 }
 0x1a6   :  { %1164 = vmatprep.subr.bf16.mxu0 %v1163_v51  ;;  %v1187_v51 = vpack.c.bf16 %v386_v50, %v383_v49  ;;  %v562_v50 = vld [vmem:[#allocation11 + $0x108] sm:$0xff] }
 0x1a9   :  { %1166 = vmatpush1.bf16.msra.mxu0 %v1165_v54  ;;  %v384_v54 = vld [vmem:[#allocation9 + $0x160] sm:$0xff] }
 0x1aa   :  { %1168 = vmatprep.subr.bf16.mxu0 %v1167_v57  ;;  %v1213_v57 = vpack.c.bf16 %v387_v56, %v384_v54  ;;  %v569_v54 = vld [vmem:[#allocation11 + $0x140] sm:$0xff] }
 0x1ad   :  { %1170 = vmatpush1.bf16.msra.mxu0 %v1169_v60  ;;  %v1215_v60 = vpack.c.bf16 %v533_v59, %v530_v58  ;;  %v1239_v58 = vpack.c.bf16 %v569_v54, %v566_v53  ;;  %v568_v59 = vld [vmem:[#allocation11 + $0x138] sm:$0xff] }
 0x1ae   :  { %1172 = vmatprep.subr.bf16.mxu0 %v1171_v63  ;;  %v532_v63 = vld [vmem:[#allocation11 + $0x18] sm:$0xff] }
 0x1af   :  { %v1217_v7 = vpack.c.bf16 %v532_v63, %v529_v62  ;;  %v572_v62 = vld [vmem:[#allocation11 + $0x158] sm:$0xff]  ;;  %v575_v63 = vld [vmem:[#allocation11 + $0x170] sm:$0xff] }
 0x1b1   :  { %1174 = vmatpush1.bf16.msra.mxu0 %v1173_v2 }
 0x1b2   :  { %1176 = vmatprep.subr.bf16.mxu0 %v1175_v5 }
 0x1b5   :  { %1178 = vmatpush1.bf16.msra.mxu0 %v1177_v8  ;;  %v1248_v8 = vpack.c.bf16 %v534_v1, %v531_v0 }
 0x1b6   :  { %1180 = vmatprep.subr.bf16.mxu0 %v1179_v13  ;;  %v1219_v13 = vpack.c.bf16 %v539_v4, %v536_v3  ;;  %v1243_v3 = vpack.c.bf16 %v575_v63, %v572_v62  ;;  %v574_v4 = vld [vmem:[#allocation11 + $0x168] sm:$0xff]  ;;  %v789_v63 = vld [vmem:[#allocation12 + $0x50] sm:$0xff] }
 0x1b9   :  { %1182 = vmatpush1.bf16.msra.mxu0 %v1181_v16  ;;  %v540_v16 = vld [vmem:[#allocation11 + $0x58] sm:$0xff] }
 0x1ba   :  { %1184 = vmatprep.subr.bf16.mxu0 %v1183_v19  ;;  %v1221_v19 = vpack.c.bf16 %v538_v14, %v535_v10  ;;  %v1251_v20 = vpack.c.bf16 %v540_v16, %v537_v15  ;;  %v779_v14 = vld [vmem:[#allocation12] sm:$0xff]  ;;  %v780_v15 = vld [vmem:[#allocation12 + $0x8] sm:$0xff]  ;;  %v781_v16 = vld [vmem:[#allocation12 + $0x10] sm:$0xff] }
 0x1bd   :  { %1186 = vmatpush1.bf16.msra.mxu0 %v1185_v22  ;;  %v1223_v22 = vpack.c.bf16 %v545_v18, %v542_v17  ;;  %v1272_v17 = vpack.c.bf16 %v780_v15, %v779_v14  ;;  %v782_v18 = vld [vmem:[#allocation12 + $0x18] sm:$0xff] }
 0x1be   :  { %1188 = vmatprep.subr.bf16.mxu0 %v1187_v51  ;;  %v561_v51 = vld [vmem:[#allocation11 + $0x100] sm:$0xff] }
 0x1bf   :  { %v1263_v56 = vpack.c.bf16 %v564_v52, %v561_v51 }
 0x1c1   :  { %1190 = vmatpush1.bf16.msra.mxu0 %v1189_v55 }
 0x1c2   :  { %1216 = vmatprep.subr.bf16.mxu0 %v1215_v60  ;;  %v567_v60 = vld [vmem:[#allocation11 + $0x130] sm:$0xff] }
 0x277   :  { %v235_v26 = vpop.f32.mrb[0].mxu0 }
 0x278   :  { %v236_v27 = vadd.f32 %v906_v23, %v235_v26  ;;  %v991_v28 = vpop.f32.mrb[1].mxu0  ;;  %v544_v23 = vld [vmem:[#allocation11 + $0x78] sm:$0xff] }
 0x279   :  { %v548_v26 = vld [vmem:[#allocation11 + $0x98] sm:$0xff]  ;;  %v1225_v28 = vpack.c.bf16 %v544_v23, %v541_v21  ;;  %v784_v21 = vld [vmem:[#allocation12 + $0x28] sm:$0xff] }
 0x27a   :  { %v239_v30 = vmax.f32 %v236_v27, 0.0  ;;  %v551_v27 = vld [vmem:[#allocation11 + $0xb0] sm:$0xff] }
 0x27b   :  { %v1227_v31 = vpack.c.bf16 %v551_v27, %v548_v26  ;;  %v137_v27 = vld [vmem:[%s1826_s9] sm:$0x3] }
 0x27c   :  { %1025 = vmatmul.mubr.f32.vlgmr.msra.gmra.mrb[0].mxu1 %v239_v30  ;;  %v547_v30 = vld [vmem:[#allocation11 + $0x90] sm:$0xff] }
 0x27d   :  { %1193 = vmatpush3.bf16.msra.mxu1 %v1192_v29  ;;  %1059 = vmatprep.mubr.msk.f32.mxu1 %vm1528_vm1, %v1529_v11  ;;  %v1254_v29 = vpack.c.bf16 %v546_v25, %v543_v24  ;;  %v1229_v37 = vpack.c.bf16 %v550_v32, %v547_v30  ;;  %v721_v24 = vlaneseq }
 0x27e   :  { %1194 = vmatprep.subr.bf16.mxu1 %v1527_v9 }
 0x27f   :  { %v722_v25 = vshrl.u32 %v721_v24, 7 }
 0x281   :  { %1196 = vmatpush3.bf16.msra.mxu1 %v1195_v33  ;;  %v549_v33 = vld [vmem:[#allocation11 + $0xa0] sm:$0xff]  ;;  %v723_v26 = vsub.s32 0, %v722_v25 }
 0x282   :  { %1197 = vmatprep.subr.bf16.mxu1 %v1527_v9  ;;  %v1257_v38 = vpack.c.bf16 %v552_v34, %v549_v33 }
 0x285   :  { %1199 = vmatpush3.bf16.msra.mxu1 %v1198_v36  ;;  %v557_v36 = vld [vmem:[#allocation11 + $0xe0] sm:$0xff] }
 0x286   :  { %1200 = vmatprep.subr.bf16.mxu1 %v1527_v9  ;;  %v1231_v40 = vpack.c.bf16 %v557_v36, %v554_v35 }
 0x289   :  { %1202 = vmatpush3.bf16.msra.mxu1 %v1201_v39  ;;  %v553_v39 = vld [vmem:[#allocation11 + $0xc0] sm:$0xff] }
 0x28a   :  { %1203 = vmatprep.subr.bf16.mxu1 %v1527_v9  ;;  %v1233_v46 = vpack.c.bf16 %v556_v41, %v553_v39 }
 0x28d   :  { %1205 = vmatpush3.bf16.msra.mxu1 %v1204_v42  ;;  %v555_v42 = vld [vmem:[#allocation11 + $0xd0] sm:$0xff] }
 0x28e   :  { %1206 = vmatprep.subr.bf16.mxu1 %v1527_v9  ;;  %v1260_v47 = vpack.c.bf16 %v558_v43, %v555_v42  ;;  %v912_v42 = vld [vmem:[%s1828_s11] ss:$0 sm:$0xff] }
 0x291   :  { %1208 = vmatpush3.bf16.msra.mxu1 %v1207_v45  ;;  %v563_v45 = vld [vmem:[#allocation11 + $0x110] sm:$0xff] }
 0x292   :  { %1209 = vmatprep.subr.bf16.mxu1 %v1527_v9  ;;  %v1235_v49 = vpack.c.bf16 %v563_v45, %v560_v44  ;;  %v911_v44 = vld [vmem:[%s1827_s10] ss:$0 sm:$0xff]  ;;  %s1531_s10 = smov [#allocation15]  }
 0x293   :  { %s890_s11 = sshll.u32 %s1531_s10, 4  ;;  %s891_s11 = int_to_ptr.vmem [resolvable:$true] %s890_s11 }
 0x294   :  { %s1461_s26 = scalar_lea.vmem %s891_s11, 128  ;;  %p1466_p7 = scmp.lt.s32.totalorder %s891_s11, %s891_s11 }
 0x295   :  { %1211 = vmatpush3.bf16.msra.mxu1 %v1210_v48  ;;  %v559_v48 = vld [vmem:[#allocation11 + $0xf0] sm:$0xff]  ;;  %p1462_p6 = scmp.ne.s32.totalorder %s891_s11, %s1461_s26  ;;  %p1467_p8 = scmp.lt.s32.totalorder %s1461_s26, %s1461_s26 }
 0x296   :  { %1212 = vmatprep.subr.bf16.mxu1 %v1527_v9  ;;  %v1237_v55 = vpack.c.bf16 %v562_v50, %v559_v48 }
 0x297   :  { %p1468_p9 = por %p1467_p8, %p1466_p7 }
 0x299   :  { %1214 = vmatpush3.bf16.msra.mxu1 %v1213_v57  ;;  %v565_v57 = vld [vmem:[#allocation11 + $0x120] sm:$0xff]  ;;  %p1469_p10 = pnand %p1468_p9, %p1462_p6 }
 0x29a   :  { %1247 = vmatprep.subr.bf16.mxu1 %v1527_v9  ;;  %v1241_v0 = vpack.c.bf16 %v568_v59, %v565_v57  ;;  %v785_v57 = vld [vmem:[#allocation12 + $0x30] sm:$0xff] }
 0x34f   :  { %v328_v2 = vpop.f32.mrb[0].mxu1 }
 0x350   :  { %v329_v5 = vadd.f32 %v908_v61, %v328_v2  ;;  %v1026_v6 = vpop.f32.mrb[1].mxu1  ;;  %v570_v61 = vld [vmem:[#allocation11 + $0x148] sm:$0xff]  ;;  %v571_v2 = vld [vmem:[#allocation11 + $0x150] sm:$0xff] }
 0x351   :  { %v1266_v1 = vpack.c.bf16 %v570_v61, %v567_v60  ;;  %v576_v6 = vld [vmem:[#allocation11 + $0x178] sm:$0xff]  ;;  %v1245_v10 = vpack.c.bf16 %v574_v4, %v571_v2  ;;  %v787_v60 = vld [vmem:[#allocation12 + $0x40] sm:$0xff]  ;;  %v788_v61 = vld [vmem:[#allocation12 + $0x48] sm:$0xff] }
 0x352   :  { %v332_v12 = vmax.f32 %v329_v5, 0.0  ;;  %v573_v5 = vld [vmem:[#allocation11 + $0x160] sm:$0xff]  ;;  %v1284_v62 = vpack.c.bf16 %v788_v61, %v787_v60 }
 0x353   :  { %v791_v2 = vld [vmem:[#allocation12 + $0x60] sm:$0xff] }
 0x354   :  { %453 = vmatmul.mubr.f32.vlgmr.msra.gmra.mrb[2].mxu0 %v332_v12  ;;  %1060 = vmatmul.mubr.f32.vlgmr.msra.gmra.mrb[2].mxu1 %v332_v12  ;;  %v1269_v12 = vpack.c.bf16 %v576_v6, %v573_v5  ;;  %v793_v5 = vld [vmem:[#allocation12 + $0x70] sm:$0xff]  ;;  %v794_v6 = vld [vmem:[#allocation12 + $0x78] sm:$0xff] }
 0x355   :  { %1218 = vmatpush1.bf16.msra.mxu0 %v1217_v7  ;;  %1249 = vmatpush3.bf16.msra.mxu1 %v1248_v8  ;;  %v337_v7 = vpop.permute.xlu1 %336  ;;  %v133_v8 = vld [vmem:[#allocation6] sm:$0xff] }
 0x356   :  { %1220 = vmatprep.subr.bf16.mxu0 %v1219_v13  ;;  %1250 = vmatprep.subr.bf16.mxu1 %v1527_v9  ;;  %v339_v13 = vmul.f32 %v337_v7, %v133_v8  ;;  %v1293_v7 = vpack.c.bf16 %v794_v6, %v793_v5 }
 0x357   :  { %641 = vmatprep.mubr.f32.mxu0 %v1529_v11  ;;  %1094 = vmatprep.mubr.msk.f32.mxu1 %vm1528_vm1, %v1529_v11 }
 0x359   :  { %1222 = vmatpush1.bf16.msra.mxu0 %v1221_v19  ;;  %1252 = vmatpush3.bf16.msra.mxu1 %v1251_v20  ;;  %v1275_v19 = vpack.c.bf16 %v782_v18, %v781_v16  ;;  %v783_v20 = vld [vmem:[#allocation12 + $0x20] sm:$0xff] }
 0x35a   :  { %1224 = vmatprep.subr.bf16.mxu0 %v1223_v22  ;;  %1253 = vmatprep.subr.bf16.mxu1 %v1527_v9  ;;  %v1278_v22 = vpack.c.bf16 %v784_v21, %v783_v20 }
 0x35d   :  { %1226 = vmatpush1.bf16.msra.mxu0 %v1225_v28  ;;  %1255 = vmatpush3.bf16.msra.mxu1 %v1254_v29  ;;  %v727_v28 = vsub.s32 1, %v722_v25  ;;  %v724_v29 = vrot.slane %v137_v27, %v723_v26 }
 0x35e   :  { %1228 = vmatprep.subr.bf16.mxu0 %v1227_v31  ;;  %1256 = vmatprep.subr.bf16.mxu1 %v1527_v9 }
 0x35f   :  { %v728_v32 = vrot.slane %v137_v27, %v727_v28 }
 0x361   :  { %1230 = vmatpush1.bf16.msra.mxu0 %v1229_v37  ;;  %1258 = vmatpush3.bf16.msra.mxu1 %v1257_v38 }
 0x362   :  { %1232 = vmatprep.subr.bf16.mxu0 %v1231_v40  ;;  %1259 = vmatprep.subr.bf16.mxu1 %v1527_v9 }
 0x365   :  { %1234 = vmatpush1.bf16.msra.mxu0 %v1233_v46  ;;  %1261 = vmatpush3.bf16.msra.mxu1 %v1260_v47 }
 0x366   :  { %1236 = vmatprep.subr.bf16.mxu0 %v1235_v49  ;;  %1262 = vmatprep.subr.bf16.mxu1 %v1527_v9 }
 0x369   :  { %1238 = vmatpush1.bf16.msra.mxu0 %v1237_v55  ;;  %1264 = vmatpush3.bf16.msra.mxu1 %v1263_v56 }
 0x36a   :  { %1240 = vmatprep.subr.bf16.mxu0 %v1239_v58  ;;  %1265 = vmatprep.subr.bf16.mxu1 %v1527_v9  ;;  %v786_v58 = vld [vmem:[#allocation12 + $0x38] sm:$0xff] }
 0x36b   :  { %v1281_v59 = vpack.c.bf16 %v786_v58, %v785_v57 }
 0x36d   :  { %1242 = vmatpush1.bf16.msra.mxu0 %v1241_v0  ;;  %1267 = vmatpush3.bf16.msra.mxu1 %v1266_v1  ;;  %v790_v0 = vld [vmem:[#allocation12 + $0x58] sm:$0xff] }
 0x36e   :  { %1244 = vmatprep.subr.bf16.mxu0 %v1243_v3  ;;  %1268 = vmatprep.subr.bf16.mxu1 %v1527_v9  ;;  %v1287_v1 = vpack.c.bf16 %v790_v0, %v789_v63  ;;  %v792_v3 = vld [vmem:[#allocation12 + $0x68] sm:$0xff] }
 0x36f   :  { %v1290_v4 = vpack.c.bf16 %v792_v3, %v791_v2 }
 0x371   :  { %1246 = vmatpush1.bf16.msra.mxu0 %v1245_v10  ;;  %1270 = vmatpush3.bf16.msra.mxu1 %v1269_v12 }
 0x372   :  { %1271 = vmatprep.subr.bf16.mxu0 %v1527_v9 }
 0x374   :  { %642 = vmatmul.mubr.f32.vlgmr.msra.gmra.mrb[2].mxu0 %v339_v13  ;;  %1095 = vmatmul.mubr.f32.vlgmr.msra.gmra.mrb[4].mxu1 %v339_v13 }
 0x375   :  { %1129 = vmatprep.mubr.msk.f32.mxu0 %vm1528_vm1, %v1529_v11  ;;  %1273 = vmatpush3.bf16.msra.mxu0 %v1272_v17 }
 0x376   :  { %1274 = vmatprep.subr.bf16.mxu0 %v1527_v9 }
 0x379   :  { %1276 = vmatpush3.bf16.msra.mxu0 %v1275_v19 }
 0x37a   :  { %1277 = vmatprep.subr.bf16.mxu0 %v1527_v9 }
 0x37d   :  { %1279 = vmatpush3.bf16.msra.mxu0 %v1278_v22 }
 0x37e   :  { %1280 = vmatprep.subr.bf16.mxu0 %v1527_v9 }
 0x381   :  { %1282 = vmatpush3.bf16.msra.mxu0 %v1281_v59 }
 0x382   :  { %1283 = vmatprep.subr.bf16.mxu0 %v1527_v9 }
 0x385   :  { %1285 = vmatpush3.bf16.msra.mxu0 %v1284_v62 }
 0x386   :  { %1286 = vmatprep.subr.bf16.mxu0 %v1527_v9 }
 0x389   :  { %1288 = vmatpush3.bf16.msra.mxu0 %v1287_v1 }
 0x38a   :  { %1289 = vmatprep.subr.bf16.mxu0 %v1527_v9 }
 0x38d   :  { %1291 = vmatpush3.bf16.msra.mxu0 %v1290_v4 }
 0x38e   :  { %1292 = vmatprep.subr.bf16.mxu0 %v1527_v9 }
 0x391   :  { %1294 = vmatpush3.bf16.msra.mxu0 %v1293_v7 }
 0x427   :  { %v525_v23 = vpop.f32.mrb[2].mxu1 }
 0x428   :  { %v1061_v11 = vpop.f32.mrb[3].mxu1  ;;  %v751_v47 = vadd.f32 %v911_v44, %v525_v23 }
 0x447   :  { %v643_v30 = vpop.f32.mrb[2].mxu0  ;;  %v714_v31 = vpop.f32.mrb[4].mxu1 }
 0x448   :  { %v731_v33 = vadd.f32 %v724_v29, %v643_v30  ;;  %v645_v34 = vpop.f32.mrb[3].mxu0  ;;  %v1096_v35 = vpop.f32.mrb[5].mxu1  ;;  %v758_v45 = vadd.f32 %v912_v42, %v714_v31 }
 0x449   :  { %v732_v37 = vadd.f32 %v728_v32, %v645_v34 }
 0x44a   :  { %v909_v36 = vmul.f32 -1.442695, %v731_v33 }
 0x44b   :  { %v910_v38 = vmul.f32 -1.442695, %v732_v37 }
 0x44c   :  { %1317 = vpow2.f32 %v909_v36 }
 0x44d   :  { %1319 = vpow2.f32 %v910_v38 }
 0x456   :  { %v1318_v39 = vpop.eup %1317 }
 0x457   :  { %v739_v40 = vadd.f32 1.0, %v1318_v39  ;;  %v1320_v41 = vpop.eup %1319 }
 0x458   :  { %v740_v43 = vadd.f32 1.0, %v1320_v41 }
 0x459   :  { %1321 = vrcp.f32 %v739_v40 }
 0x45a   :  { %1323 = vrcp.f32 %v740_v43 }
 0x463   :  { %v1322_v46 = vpop.eup %1321 }
 0x464   :  { %v759_v48 = vmul.f32 %v1322_v46, %v758_v45  ;;  %v1324_v50 = vpop.eup %1323 }
 0x465   :  { %v762_v51 = vsub.f32 1.0, %v1324_v50  ;;  %v764_v54 = vmul.f32 %v1324_v50, %v339_v13 }
 0x466   :  { %v760_v49 = vadd.f32 %v759_v48, %v751_v47 }
 0x468   :  { %1325 = vtanh.f32 %v760_v49 }
 0x472   :  { %v1326_v52 = vpop.eup %1325 }
 0x473   :  { %v763_v53 = vmul.f32 %v1326_v52, %v762_v51 }
 0x475   :  { %v765_v55 = vadd.f32 %v764_v54, %v763_v53 }
 0x477   :  { %766 = vadd.xlane.f32.xlu1 %v765_v55  ;;  %873 = vst [vmem:[#allocation15] sm:$0xff] %v765_v55  ;;  %v769_v56 = vmul.f32 %v765_v55, %v765_v55 }
 0x479   :  { %770 = vadd.xlane.f32.xlu0 %v769_v56 }
 0x504   :  { %v767_v8 = vpop.xlane.xlu1 %766 }
 0x505   :  { %v768_v10 = vmul.f32 0.03125, %v767_v8 }
 0x506   :  { %v771_v12 = vpop.xlane.xlu0 %770 }
 0x507   :  { %v774_v13 = vmul.f32 %v768_v10, %v768_v10  ;;  %v772_v14 = vmul.f32 0.03125, %v771_v12  ;;  %v773_v17 = vsub.f32 %v765_v55, %v768_v10 }
 0x509   :  { %v775_v15 = vsub.f32 %v772_v14, %v774_v13 }
 0x50b   :  { %v776_v16 = vadd.f32 1e-05, %v775_v15 }
 0x50d   :  { %1327 = vrsqrt.f32 %v776_v16 }
 0x517   :  { %v1328_v18 = vpop.eup %1327 }
 0x518   :  { %v778_v19 = vmul.f32 %v1328_v18, %v773_v17 }
 0x51a   :  { %1130 = vmatmul.mubr.f32.vlgmr.msra.gmra.mrb[4].mxu0 %v778_v19 }
 0x51b   :  { %1472 = shalt.err (!%p1469_p10)
}
 0x51c   :  { %s1473_s29 = scalar_lea.hbm %s1832_s15, 128 }
 0x51d   :  { %p1474_p11 = scmp.ne.s32.totalorder %s1832_s15, %s1473_s29  ;;  %p1477_p12 = scmp.lt.u32.totalorder %s1473_s29, %s1832_s15 }
 0x51f   :  { %p1479_p13 = pnand %p1477_p12, %p1474_p11 }
 0x521   :  { %1482 = shalt.err (!%p1479_p13)
}
 0x522   :  { %893 = dma.vmem_to_hbm [thread:$0]  %s891_s11, 128, %s1832_s15, [#allocation16]   ;;  %v913_v9 = vld [vmem:[%s1830_s13] ss:$0 sm:$0xff] }
 0x523   :  { %s1532_s0 = smov [#allocation14]  }
 0x524   :  { %s880_s30 = sshll.u32 %s1532_s0, 4  ;;  %s881_s30 = int_to_ptr.vmem [resolvable:$true] %s880_s30 }
 0x525   :  { %s1483_s3 = scalar_lea.vmem %s881_s30, 128  ;;  %p1488_p1 = scmp.lt.s32.totalorder %s881_s30, %s881_s30 }
 0x526   :  { %p1484_p0 = scmp.ne.s32.totalorder %s881_s30, %s1483_s3  ;;  %p1489_p2 = scmp.lt.s32.totalorder %s1483_s3, %s1483_s3 }
 0x528   :  { %p1490_p3 = por %p1489_p2, %p1488_p1 }
 0x52a   :  { %p1491_p4 = pnand %p1490_p3, %p1484_p0 }
 0x5ed   :  { %v867_v20 = vpop.f32.mrb[4].mxu0 }
 0x5ee   :  { %v868_v21 = vadd.f32 %v913_v9, %v867_v20  ;;  %v1131_v22 = vpop.f32.mrb[5].mxu0 }
 0x5f0   :  { %871 = vst [vmem:[#allocation14] sm:$0xff] %v868_v21 }
 0x5f1   :  { %1494 = shalt.err (!%p1491_p4)
}
 0x5f2   :  { %s1495_s2 = scalar_lea.hbm %s1831_s14, 128 }
 0x5f3   :  { %p1496_p5 = scmp.ne.s32.totalorder %s1831_s14, %s1495_s2  ;;  %p1499_p6 = scmp.lt.u32.totalorder %s1495_s2, %s1831_s14 }
 0x5f5   :  { %p1501_p7 = pnand %p1499_p6, %p1496_p5 }
 0x5f7   :  { %1504 = shalt.err (!%p1501_p7)
}
 0x5f8   :  { %883 = dma.vmem_to_hbm [thread:$0]  %s881_s30, 128, %s1831_s14, [#allocation5]  }
 0x5f9   :  { %1513 = dma.done.wait [#allocation5], 128  }
 0x5fa   :  { %1514 = vsyncadd [#allocation5], 4294967168 }
 0x5fb   :  { %1515 = dma.done.wait [#allocation16], 128  }
 0x5fc   :  { %1516 = vsyncadd [#allocation16], 4294967168 }
 0x5fd   :  { %900 = vsyncpa [#allocation4], 1 }
 0x5fe   :  { %901 = vsyncpa [#allocation7], 1 }
 0x5ff   :  { %902 = vsyncpa [#allocation10], 1 }
 0x600   :  { %903 = vsyncpa [#allocation13], 1 }
 0x601   :  { %904 = vsyncpa [#allocation5], 1 }
 0x602   :  { %905 = vsyncpa [#allocation16], 1 }

// kernel: tpu_custom_call.1
= control target key start
LH: loop header
LB: loop body
LE: loop exit
PB: predicated region body
PF: predicated region fallthrough
CT: control target
= control target key end

     0   :  { %21 = vsyncpa [#allocation4], 0  ;;  %s1817_s0 = inlined_call_operand.hbm [shape: f32[1,8,16], index: 0, kind: input, shape index: {}]   ;;  %s1818_s1 = inlined_call_operand.hbm [shape: f32[8,128], index: 1, kind: input, shape index: {}]   ;;  %s1819_s2 = inlined_call_operand.vmem [shape: f32[1,8,1], index: 2, kind: input, shape index: {}]   ;;  %s1820_s3 = inlined_call_operand.vmem [shape: f32[16,128], index: 3, kind: input, shape index: {}]   ;;  %s1821_s4 = inlined_call_operand.vmem [shape: f32[1,128], index: 4, kind: input, shape index: {}]   ;;  %s1822_s5 = inlined_call_operand.hbm [shape: f32[128,128], index: 5, kind: input, shape index: {}]   ;;  %s1823_s6 = inlined_call_operand.vmem [shape: f32[1,128], index: 6, kind: input, shape index: {}]   ;;  %s1824_s7 = inlined_call_operand.hbm [shape: f32[128,384], index: 7, kind: input, shape index: {}]   ;;  %s1825_s8 = inlined_call_operand.hbm [shape: f32[128,384], index: 8, kind: input, shape index: {}]   ;;  %s1826_s9 = inlined_call_operand.vmem [shape: f32[1,256], index: 9, kind: input, shape index: {}]   ;;  %s1827_s10 = inlined_call_operand.vmem [shape: f32[1,128], index: 10, kind: input, shape index: {}]   ;;  %s1828_s11 = inlined_call_operand.vmem [shape: f32[1,128], index: 11, kind: input, shape index: {}]   ;;  %s1829_s12 = inlined_call_operand.hbm [shape: f32[128,128], index: 12, kind: input, shape index: {}]   ;;  %s1830_s13 = inlined_call_operand.vmem [shape: f32[1,128], index: 13, kind: input, shape index: {}]   ;;  %s1831_s14 = inlined_call_operand.hbm [shape: f32[1,8,128], index: 14, kind: output, shape index: {0}]   ;;  %s1832_s15 = inlined_call_operand.hbm [shape: f32[8,128], index: 15, kind: output, shape index: {1}]  }
   0x1   :  { %22 = vsyncpa [#allocation7], 0 }
   0x2   :  { %23 = vsyncpa [#allocation10], 0 }
   0x3   :  { %24 = vsyncpa [#allocation13], 0 }
   0x4   :  { %25 = vsyncpa [#allocation5], 0 }
   0x5   :  { %26 = vsyncpa [#allocation16], 0  ;;  %s1517_s18 = smov [#allocation6]   ;;  %s1518_s20 = smov [#allocation9]  }
   0x6   :  { %s43_s19 = sshll.u32 %s1517_s18, 4  ;;  %s72_s21 = sshll.u32 %s1518_s20, 4  ;;  %s44_s19 = int_to_ptr.vmem [resolvable:$true] %s43_s19  ;;  %s1613_s21 = int_to_ptr.vmem [resolvable:$true] %s72_s21 }
   0x7   :  { %s1329_s24 = scalar_lea.hbm %s1818_s1, 128 }
   0x8   :  { %p1330_p0 = scmp.ne.s32.totalorder %s1818_s1, %s1329_s24  ;;  %p1333_p1 = scmp.lt.u32.totalorder %s1329_s24, %s1818_s1 }
   0xa   :  { %p1335_p2 = pnand %p1333_p1, %p1330_p0 }
   0xc   :  { %1338 = shalt.err (!%p1335_p2)
}
   0xd   :  { %s1339_s29 = scalar_lea.vmem %s44_s19, 128  ;;  %p1344_p4 = scmp.lt.s32.totalorder %s44_s19, %s44_s19 }
   0xe   :  { %p1340_p3 = scmp.ne.s32.totalorder %s44_s19, %s1339_s29  ;;  %p1345_p5 = scmp.lt.s32.totalorder %s1339_s29, %s1339_s29 }
  0x10   :  { %p1346_p6 = por %p1345_p5, %p1344_p4 }
  0x12   :  { %p1347_p7 = pnand %p1346_p6, %p1340_p3 }
  0x14   :  { %1350 = shalt.err (!%p1347_p7)
}
  0x15   :  { %46 = dma.hbm_to_vmem [thread:$0]  %s1818_s1, 128, %s44_s19, [#allocation7]  }
  0x16   :  { %s1351_s20 = scalar_lea.hbm %s1824_s7, 6144 }
  0x17   :  { %p1352_p8 = scmp.ne.s32.totalorder %s1824_s7, %s1351_s20  ;;  %p1355_p9 = scmp.lt.u32.totalorder %s1351_s20, %s1824_s7 }
  0x19   :  { %p1357_p10 = pnand %p1355_p9, %p1352_p8 }
  0x1b   :  { %1360 = shalt.err (!%p1357_p10)
}
  0x1c   :  { %s1361_s26 = scalar_lea.vmem %s1613_s21, 6144  ;;  %p1366_p12 = scmp.lt.s32.totalorder %s1613_s21, %s1613_s21 }
  0x1d   :  { %p1362_p11 = scmp.ne.s32.totalorder %s1613_s21, %s1361_s26  ;;  %p1367_p13 = scmp.lt.s32.totalorder %s1361_s26, %s1361_s26 }
  0x1f   :  { %p1368_p0 = por %p1367_p13, %p1366_p12 }
  0x21   :  { %p1369_p1 = pnand %p1368_p0, %p1362_p11 }
  0x23   :  { %1372 = shalt.err (!%p1369_p1)
}
  0x24   :  { %s1519_s1 = smov 384   ;;  %s1520_s19 = smov 24  }
  0x25   :  { %78 = dma.hbm_to_vmem [thread:$0]  %s1824_s7, 6144, %s1613_s21, [#allocation10], %s1519_s1, %s1519_s1, %s1520_s19  }
  0x26   :  { %s1521_s29 = smov [#allocation3]   ;;  %s1522_s16 = smov [#allocation8]  }
  0x27   :  { %s33_s30 = sshll.u32 %s1521_s29, 4  ;;  %s58_s17 = sshll.u32 %s1522_s16, 4  ;;  %s34_s30 = int_to_ptr.vmem [resolvable:$true] %s33_s30  ;;  %s1647_s17 = int_to_ptr.vmem [resolvable:$true] %s58_s17 }
  0x28   :  { %s1373_s22 = scalar_lea.hbm %s1817_s0, 128 }
  0x29   :  { %p1374_p2 = scmp.ne.s32.totalorder %s1817_s0, %s1373_s22  ;;  %p1377_p3 = scmp.lt.u32.totalorder %s1373_s22, %s1817_s0 }
  0x2b   :  { %p1379_p4 = pnand %p1377_p3, %p1374_p2 }
  0x2d   :  { %1382 = shalt.err (!%p1379_p4)
}
  0x2e   :  { %s1383_s7 = scalar_lea.vmem %s34_s30, 128  ;;  %p1388_p6 = scmp.lt.s32.totalorder %s34_s30, %s34_s30 }
  0x2f   :  { %p1384_p5 = scmp.ne.s32.totalorder %s34_s30, %s1383_s7  ;;  %p1389_p7 = scmp.lt.s32.totalorder %s1383_s7, %s1383_s7 }
  0x31   :  { %p1390_p8 = por %p1389_p7, %p1388_p6 }
  0x33   :  { %p1391_p9 = pnand %p1390_p8, %p1384_p5 }
  0x35   :  { %1394 = shalt.err (!%p1391_p9)
}
  0x36   :  { %36 = dma.hbm_to_vmem [thread:$0]  %s1817_s0, 128, %s34_s30, [#allocation4]  }
  0x37   :  { %s1395_s16 = scalar_lea.hbm %s1822_s5, 2048 }
  0x38   :  { %p1396_p10 = scmp.ne.s32.totalorder %s1822_s5, %s1395_s16  ;;  %p1399_p11 = scmp.lt.u32.totalorder %s1395_s16, %s1822_s5 }
  0x3a   :  { %p1401_p12 = pnand %p1399_p11, %p1396_p10 }
  0x3c   :  { %1404 = shalt.err (!%p1401_p12)
}
  0x3d   :  { %s1405_s24 = scalar_lea.vmem %s1647_s17, 2048  ;;  %p1410_p0 = scmp.lt.s32.totalorder %s1647_s17, %s1647_s17 }
  0x3e   :  { %p1406_p13 = scmp.ne.s32.totalorder %s1647_s17, %s1405_s24  ;;  %p1411_p1 = scmp.lt.s32.totalorder %s1405_s24, %s1405_s24 }
  0x40   :  { %p1412_p2 = por %p1411_p1, %p1410_p0 }
  0x42   :  { %p1413_p3 = pnand %p1412_p2, %p1406_p13 }
  0x44   :  { %1416 = shalt.err (!%p1413_p3)
}
  0x45   :  { %s1523_s0 = smov 128   ;;  %s1524_s30 = smov 8  }
  0x46   :  { %64 = dma.hbm_to_vmem [thread:$0]  %s1822_s5, 2048, %s1647_s17, [#allocation7], %s1523_s0, %s1523_s0, %s1524_s30  }
  0x47   :  { %s1525_s7 = smov [#allocation11]   ;;  %s1526_s27 = smov [#allocation12]  }
  0x48   :  { %s84_s21 = sshll.u32 %s1525_s7, 4  ;;  %s102_s28 = sshll.u32 %s1526_s27, 4  ;;  %s85_s21 = int_to_ptr.vmem [resolvable:$true] %s84_s21  ;;  %s1681_s28 = int_to_ptr.vmem [resolvable:$true] %s102_s28 }
  0x49   :  { %s1417_s18 = scalar_lea.hbm %s1825_s8, 6144 }
  0x4a   :  { %p1418_p4 = scmp.ne.s32.totalorder %s1825_s8, %s1417_s18  ;;  %p1421_p5 = scmp.lt.u32.totalorder %s1417_s18, %s1825_s8 }
  0x4c   :  { %p1423_p6 = pnand %p1421_p5, %p1418_p4 }
  0x4e   :  { %1426 = shalt.err (!%p1423_p6)
}
  0x4f   :  { %s1427_s5 = scalar_lea.vmem %s85_s21, 6144  ;;  %p1432_p8 = scmp.lt.s32.totalorder %s85_s21, %s85_s21 }
  0x50   :  { %p1428_p7 = scmp.ne.s32.totalorder %s85_s21, %s1427_s5  ;;  %p1433_p9 = scmp.lt.s32.totalorder %s1427_s5, %s1427_s5 }
  0x52   :  { %p1434_p10 = por %p1433_p9, %p1432_p8 }
  0x54   :  { %p1435_p11 = pnand %p1434_p10, %p1428_p7 }
  0x56   :  { %1438 = shalt.err (!%p1435_p11)
}
  0x57   :  { %90 = dma.hbm_to_vmem [thread:$0]  %s1825_s8, 6144, %s85_s21, [#allocation10], %s1519_s1, %s1519_s1, %s1520_s19  }
  0x58   :  { %s1439_s27 = scalar_lea.hbm %s1829_s12, 2048 }
  0x59   :  { %p1440_p12 = scmp.ne.s32.totalorder %s1829_s12, %s1439_s27  ;;  %p1443_p13 = scmp.lt.u32.totalorder %s1439_s27, %s1829_s12 }
  0x5b   :  { %p1445_p0 = pnand %p1443_p13, %p1440_p12 }
  0x5d   :  { %1448 = shalt.err (!%p1445_p0)
}
  0x5e   :  { %s1449_s22 = scalar_lea.vmem %s1681_s28, 2048  ;;  %p1454_p2 = scmp.lt.s32.totalorder %s1681_s28, %s1681_s28 }
  0x5f   :  { %p1450_p1 = scmp.ne.s32.totalorder %s1681_s28, %s1449_s22  ;;  %p1455_p3 = scmp.lt.s32.totalorder %s1449_s22, %s1449_s22 }
  0x61   :  { %p1456_p4 = por %p1455_p3, %p1454_p2 }
  0x63   :  { %p1457_p5 = pnand %p1456_p4, %p1450_p1 }
  0x65   :  { %1460 = shalt.err (!%p1457_p5)
}
  0x66   :  { %108 = dma.hbm_to_vmem [thread:$0]  %s1829_s12, 2048, %s1681_s28, [#allocation13], %s1523_s0, %s1523_s0, %s1524_s30  }
  0x67   :  { %1505 = dma.done.wait [#allocation4], 128  }
  0x68   :  { %1506 = vsyncadd [#allocation4], 4294967168 }
  0x69   :  { %1507 = dma.done.wait [#allocation7], 2176  }
  0x6a   :  { %1508 = vsyncadd [#allocation7], 4294965120 }
  0x6b   :  { %1509 = dma.done.wait [#allocation10], 12288  }
  0x6c   :  { %1510 = vsyncadd [#allocation10], 4294955008 }
  0x6d   :  { %1511 = dma.done.wait [#allocation13], 2048  }
  0x6e   :  { %1512 = vsyncadd [#allocation13], 4294965248  ;;  %vm143_vm0 = vcmask 130048   ;;  %v142_v0 = vld [vmem:[#allocation3] sm:$0xff]  ;;  %v159_v8 = vld [vmem:[%s1820_s3 + $0x8] sm:$0xff]  ;;  %v1527_v9 = vmov 0.0|0.0  }
  0x6f   :  { %v144_v1 = vsel %vm143_vm0, %v142_v0, 0.0  ;;  %v158_v7 = vld [vmem:[%s1820_s3] sm:$0xff]  ;;  %1132 = vmatprep.subr.bf16.mxu0 %v1527_v9  ;;  %vm1528_vm1 = vmmov 0   ;;  %v1529_v11 = vmov 0.0   ;;  %1135 = vmatprep.subr.bf16.mxu1 %v1527_v9  ;;  %v240_v12 = vld [vmem:[#allocation8] sm:$0xff]  ;;  %v241_v13 = vld [vmem:[#allocation8 + $0x8] sm:$0xff] }
  0x70   :  { %145 = vadd.xlane.f32.xlu0 %v144_v1  ;;  %v1133_v10 = vpack.c.bf16 %v159_v8, %v158_v7  ;;  %989 = vmatprep.mubr.msk.f32.mxu0 %vm1528_vm1, %v1529_v11  ;;  %v242_v14 = vld [vmem:[#allocation8 + $0x10] sm:$0xff]  ;;  %v1136_v15 = vpack.c.bf16 %v241_v13, %v240_v12  ;;  %v243_v16 = vld [vmem:[#allocation8 + $0x18] sm:$0xff]  ;;  %v244_v18 = vld [vmem:[#allocation8 + $0x20] sm:$0xff]  ;;  %v1530_v44 = vmov 0  }
  0x71   :  { %1024 = vmatprep.mubr.msk.f32.mxu1 %vm1528_vm1, %v1529_v11  ;;  %v1139_v17 = vpack.c.bf16 %v243_v16, %v242_v14  ;;  %v245_v19 = vld [vmem:[#allocation8 + $0x28] sm:$0xff]  ;;  %v246_v21 = vld [vmem:[#allocation8 + $0x30] sm:$0xff]  ;;  %v247_v22 = vld [vmem:[#allocation8 + $0x38] sm:$0xff]  ;;  %1313 = vset.pattern.permute.xlu1 %v1530_v44 }
  0x72   :  { %1134 = vmatpush3.bf16.msra.mxu0 %v1133_v10  ;;  %1137 = vmatpush3.bf16.msra.mxu1 %v1136_v15  ;;  %v1142_v20 = vpack.c.bf16 %v245_v19, %v244_v18  ;;  %v1145_v23 = vpack.c.bf16 %v247_v22, %v246_v21  ;;  %v248_v24 = vld [vmem:[#allocation8 + $0x40] sm:$0xff]  ;;  %v249_v25 = vld [vmem:[#allocation8 + $0x48] sm:$0xff]  ;;  %v250_v27 = vld [vmem:[#allocation8 + $0x50] sm:$0xff] }
  0x73   :  { %1138 = vmatprep.subr.bf16.mxu1 %v1527_v9  ;;  %v1148_v26 = vpack.c.bf16 %v249_v25, %v248_v24  ;;  %v251_v28 = vld [vmem:[#allocation8 + $0x58] sm:$0xff]  ;;  %v252_v30 = vld [vmem:[#allocation8 + $0x60] sm:$0xff]  ;;  %v253_v31 = vld [vmem:[#allocation8 + $0x68] sm:$0xff]  ;;  %1314 = vset.pattern.permute.xlu0 %v1530_v44 }
  0x74   :  { %v1151_v29 = vpack.c.bf16 %v251_v28, %v250_v27  ;;  %v1154_v32 = vpack.c.bf16 %v253_v31, %v252_v30  ;;  %v254_v38 = vld [vmem:[#allocation8 + $0x70] sm:$0xff]  ;;  %v255_v39 = vld [vmem:[#allocation8 + $0x78] sm:$0xff]  ;;  %v341_v42 = vld [vmem:[#allocation9 + $0x8] sm:$0xff] }
  0x75   :  { %v1157_v40 = vpack.c.bf16 %v255_v39, %v254_v38  ;;  %v333_v41 = vld [vmem:[%s1819_s2] sm:$0xff]  ;;  %v344_v43 = vld [vmem:[#allocation9 + $0x20] sm:$0xff]  ;;  %v343_v47 = vld [vmem:[#allocation9 + $0x18] sm:$0xff] }
  0x76   :  { %1140 = vmatpush3.bf16.msra.mxu1 %v1139_v17  ;;  %v1159_v45 = vpack.c.bf16 %v344_v43, %v341_v42  ;;  %v340_v46 = vld [vmem:[#allocation9] sm:$0xff]  ;;  %336 = vperm.xlu1 %1313, %v333_v41   ;;  %v347_v49 = vld [vmem:[#allocation9 + $0x38] sm:$0xff]  ;;  %v350_v50 = vld [vmem:[#allocation9 + $0x50] sm:$0xff] }
  0x77   :  { %1141 = vmatprep.subr.bf16.mxu1 %v1527_v9  ;;  %v1161_v48 = vpack.c.bf16 %v343_v47, %v340_v46  ;;  %v1163_v51 = vpack.c.bf16 %v350_v50, %v347_v49  ;;  %v346_v52 = vld [vmem:[#allocation9 + $0x30] sm:$0xff]  ;;  %v349_v53 = vld [vmem:[#allocation9 + $0x48] sm:$0xff]  ;;  %v356_v56 = vld [vmem:[#allocation9 + $0x80] sm:$0xff] }
  0x78   :  { %1160 = vmatprep.subr.bf16.mxu0 %v1159_v45  ;;  %v1165_v54 = vpack.c.bf16 %v349_v53, %v346_v52  ;;  %v353_v55 = vld [vmem:[#allocation9 + $0x68] sm:$0xff]  ;;  %v352_v58 = vld [vmem:[#allocation9 + $0x60] sm:$0xff]  ;;  %v355_v59 = vld [vmem:[#allocation9 + $0x78] sm:$0xff] }
  0x79   :  { %v1167_v57 = vpack.c.bf16 %v356_v56, %v353_v55  ;;  %v1169_v60 = vpack.c.bf16 %v355_v59, %v352_v58  ;;  %v359_v61 = vld [vmem:[#allocation9 + $0x98] sm:$0xff]  ;;  %v362_v62 = vld [vmem:[#allocation9 + $0xb0] sm:$0xff]  ;;  %v361_v1 = vld [vmem:[#allocation9 + $0xa8] sm:$0xff] }
  0x7a   :  { %1143 = vmatpush3.bf16.msra.mxu1 %v1142_v20  ;;  %v1171_v63 = vpack.c.bf16 %v362_v62, %v359_v61  ;;  %v367_v7 = vld [vmem:[#allocation9 + $0xd8] sm:$0xff]  ;;  %v374_v12 = vld [vmem:[#allocation9 + $0x110] sm:$0xff]  ;;  %v373_v15 = vld [vmem:[#allocation9 + $0x108] sm:$0xff] }
  0x7b   :  { %1144 = vmatprep.subr.bf16.mxu1 %v1527_v9  ;;  %v371_v10 = vld [vmem:[#allocation9 + $0xf8] sm:$0xff]  ;;  %v370_v14 = vld [vmem:[#allocation9 + $0xf0] sm:$0xff]  ;;  %v377_v17 = vld [vmem:[#allocation9 + $0x128] sm:$0xff] }
  0x7c   :  { %v1179_v13 = vpack.c.bf16 %v374_v12, %v371_v10  ;;  %v1181_v16 = vpack.c.bf16 %v373_v15, %v370_v14  ;;  %v380_v18 = vld [vmem:[#allocation9 + $0x140] sm:$0xff]  ;;  %v379_v21 = vld [vmem:[#allocation9 + $0x138] sm:$0xff]  ;;  %v342_v24 = vld [vmem:[#allocation9 + $0x10] sm:$0xff] }
  0x7d   :  { %v1183_v19 = vpack.c.bf16 %v380_v18, %v377_v17  ;;  %v376_v20 = vld [vmem:[#allocation9 + $0x120] sm:$0xff]  ;;  %v345_v25 = vld [vmem:[#allocation9 + $0x28] sm:$0xff]  ;;  %v363_v38 = vld [vmem:[#allocation9 + $0xb8] sm:$0xff] }
  0x7e   :  { %1146 = vmatpush3.bf16.msra.mxu1 %v1145_v23  ;;  %v1185_v22 = vpack.c.bf16 %v379_v21, %v376_v20  ;;  %v906_v23 = vld [vmem:[%s1821_s4] ss:$0 sm:$0xff]  ;;  %v348_v31 = vld [vmem:[#allocation9 + $0x40] sm:$0xff]  ;;  %v369_v41 = vld [vmem:[#allocation9 + $0xe8] sm:$0xff] }
  0x7f   :  { %1147 = vmatprep.subr.bf16.mxu1 %v1527_v9  ;;  %v372_v43 = vld [vmem:[#allocation9 + $0x100] sm:$0xff]  ;;  %v375_v44 = vld [vmem:[#allocation9 + $0x118] sm:$0xff]  ;;  %v378_v46 = vld [vmem:[#allocation9 + $0x130] sm:$0xff] }
  0x80   :  { %v1207_v45 = vpack.c.bf16 %v375_v44, %v372_v43  ;;  %v381_v47 = vld [vmem:[#allocation9 + $0x148] sm:$0xff]  ;;  %v383_v49 = vld [vmem:[#allocation9 + $0x158] sm:$0xff]  ;;  %v386_v50 = vld [vmem:[#allocation9 + $0x170] sm:$0xff] }
  0x81   :  { %v382_v52 = vld [vmem:[#allocation9 + $0x150] sm:$0xff]  ;;  %v385_v53 = vld [vmem:[#allocation9 + $0x168] sm:$0xff]  ;;  %v387_v56 = vld [vmem:[#allocation9 + $0x178] sm:$0xff] }
  0x82   :  { %1149 = vmatpush3.bf16.msra.mxu1 %v1148_v26  ;;  %v1189_v55 = vpack.c.bf16 %v385_v53, %v382_v52  ;;  %v530_v58 = vld [vmem:[#allocation11 + $0x8] sm:$0xff]  ;;  %v533_v59 = vld [vmem:[#allocation11 + $0x20] sm:$0xff]  ;;  %v908_v61 = vld [vmem:[%s1823_s6] ss:$0 sm:$0xff] }
  0x83   :  { %1150 = vmatprep.subr.bf16.mxu1 %v1527_v9  ;;  %v529_v62 = vld [vmem:[#allocation11] sm:$0xff]  ;;  %v535_v10 = vld [vmem:[#allocation11 + $0x30] sm:$0xff]  ;;  %v538_v14 = vld [vmem:[#allocation11 + $0x48] sm:$0xff] }
  0x84   :  { %v537_v15 = vld [vmem:[#allocation11 + $0x40] sm:$0xff]  ;;  %v542_v17 = vld [vmem:[#allocation11 + $0x68] sm:$0xff]  ;;  %v560_v44 = vld [vmem:[#allocation11 + $0xf8] sm:$0xff] }
  0x85   :  { %v545_v18 = vld [vmem:[#allocation11 + $0x80] sm:$0xff]  ;;  %v558_v43 = vld [vmem:[#allocation11 + $0xe8] sm:$0xff]  ;;  %v564_v52 = vld [vmem:[#allocation11 + $0x118] sm:$0xff] }
  0x86   :  { %1152 = vmatpush3.bf16.msra.mxu1 %v1151_v29  ;;  %v1192_v29 = vpack.c.bf16 %v345_v25, %v342_v24  ;;  %v541_v21 = vld [vmem:[#allocation11 + $0x60] sm:$0xff]  ;;  %v543_v24 = vld [vmem:[#allocation11 + $0x70] sm:$0xff]  ;;  %v546_v25 = vld [vmem:[#allocation11 + $0x88] sm:$0xff] }
  0x87   :  { %1153 = vmatprep.subr.bf16.mxu1 %v1527_v9  ;;  %v566_v53 = vld [vmem:[#allocation11 + $0x128] sm:$0xff] }
  0x8a   :  { %1155 = vmatpush3.bf16.msra.mxu1 %v1154_v32  ;;  %v351_v32 = vld [vmem:[#allocation9 + $0x58] sm:$0xff] }
  0x8b   :  { %1156 = vmatprep.subr.bf16.mxu1 %v1527_v9 }
  0x8e   :  { %1158 = vmatpush3.bf16.msra.mxu1 %v1157_v40  ;;  %v366_v40 = vld [vmem:[#allocation9 + $0xd0] sm:$0xff] }
  0x8f   :  { %1191 = vmatprep.subr.bf16.mxu1 %v1527_v9  ;;  %v1204_v42 = vpack.c.bf16 %v369_v41, %v366_v40  ;;  %v556_v41 = vld [vmem:[#allocation11 + $0xd8] sm:$0xff] }
  0xfd   :  { %v146_v2 = vpop.xlane.xlu0 %145 }
  0xfe   :  { %v148_v3 = vmul.f32 0.0625, %v146_v2 }
 0x100   :  { %v149_v4 = vsub.f32 %v142_v0, %v148_v3  ;;  %v358_v0 = vld [vmem:[#allocation9 + $0x90] sm:$0xff]  ;;  %v365_v3 = vld [vmem:[#allocation9 + $0xc8] sm:$0xff] }
 0x101   :  { %v1173_v2 = vpack.c.bf16 %v361_v1, %v358_v0  ;;  %v531_v0 = vld [vmem:[#allocation11 + $0x10] sm:$0xff]  ;;  %v534_v1 = vld [vmem:[#allocation11 + $0x28] sm:$0xff] }
 0x102   :  { %v150_v5 = vmul.f32 %v149_v4, %v149_v4 }
 0x104   :  { %v151_v6 = vsel %vm143_vm0, %v150_v5, 0.0 }
 0x105   :  { %152 = vadd.xlane.f32.xlu0 %v151_v6  ;;  %v364_v6 = vld [vmem:[#allocation9 + $0xc0] sm:$0xff] }
 0x106   :  { %v1177_v8 = vpack.c.bf16 %v367_v7, %v364_v6 }
 0x192   :  { %v153_v33 = vpop.xlane.xlu0 %152 }
 0x193   :  { %v154_v34 = vmul.f32 0.0625, %v153_v33  ;;  %v1195_v33 = vpack.c.bf16 %v351_v32, %v348_v31  ;;  %v550_v32 = vld [vmem:[#allocation11 + $0xa8] sm:$0xff] }
 0x195   :  { %v155_v35 = vadd.f32 1e-05, %v154_v34  ;;  %v354_v34 = vld [vmem:[#allocation9 + $0x70] sm:$0xff] }
 0x197   :  { %1315 = vrsqrt.f32 %v155_v35  ;;  %v357_v35 = vld [vmem:[#allocation9 + $0x88] sm:$0xff] }
 0x1a1   :  { %v1316_v36 = vpop.eup %1315 }
 0x1a2   :  { %v157_v37 = vmul.f32 %v1316_v36, %v149_v4  ;;  %v368_v4 = vld [vmem:[#allocation9 + $0xe0] sm:$0xff]  ;;  %v1198_v36 = vpack.c.bf16 %v357_v35, %v354_v34  ;;  %v552_v34 = vld [vmem:[#allocation11 + $0xb8] sm:$0xff]  ;;  %v554_v35 = vld [vmem:[#allocation11 + $0xc8] sm:$0xff] }
 0x1a3   :  { %v1175_v5 = vpack.c.bf16 %v368_v4, %v365_v3  ;;  %v536_v3 = vld [vmem:[#allocation11 + $0x38] sm:$0xff]  ;;  %v539_v4 = vld [vmem:[#allocation11 + $0x50] sm:$0xff] }
 0x1a4   :  { %990 = vmatmul.mubr.msk.f32.vlgmr.msra.gmra.mrb[0].mxu0 %vm143_vm0, %v157_v37  ;;  %v360_v37 = vld [vmem:[#allocation9 + $0xa0] sm:$0xff] }
 0x1a5   :  { %452 = vmatprep.mubr.f32.mxu0 %v1529_v11  ;;  %1162 = vmatpush1.bf16.msra.mxu0 %v1161_v48  ;;  %v1201_v39 = vpack.c.bf16 %v363_v38, %v360_v37  ;;  %v1210_v48 = vpack.c.bf16 %v381_v47, %v378_v46 }
 0x1a6   :  { %1164 = vmatprep.subr.bf16.mxu0 %v1163_v51  ;;  %v1187_v51 = vpack.c.bf16 %v386_v50, %v383_v49  ;;  %v562_v50 = vld [vmem:[#allocation11 + $0x108] sm:$0xff] }
 0x1a9   :  { %1166 = vmatpush1.bf16.msra.mxu0 %v1165_v54  ;;  %v384_v54 = vld [vmem:[#allocation9 + $0x160] sm:$0xff] }
 0x1aa   :  { %1168 = vmatprep.subr.bf16.mxu0 %v1167_v57  ;;  %v1213_v57 = vpack.c.bf16 %v387_v56, %v384_v54  ;;  %v569_v54 = vld [vmem:[#allocation11 + $0x140] sm:$0xff] }
 0x1ad   :  { %1170 = vmatpush1.bf16.msra.mxu0 %v1169_v60  ;;  %v1215_v60 = vpack.c.bf16 %v533_v59, %v530_v58  ;;  %v1239_v58 = vpack.c.bf16 %v569_v54, %v566_v53  ;;  %v568_v59 = vld [vmem:[#allocation11 + $0x138] sm:$0xff] }
 0x1ae   :  { %1172 = vmatprep.subr.bf16.mxu0 %v1171_v63  ;;  %v532_v63 = vld [vmem:[#allocation11 + $0x18] sm:$0xff] }
 0x1af   :  { %v1217_v7 = vpack.c.bf16 %v532_v63, %v529_v62  ;;  %v572_v62 = vld [vmem:[#allocation11 + $0x158] sm:$0xff]  ;;  %v575_v63 = vld [vmem:[#allocation11 + $0x170] sm:$0xff] }
 0x1b1   :  { %1174 = vmatpush1.bf16.msra.mxu0 %v1173_v2 }
 0x1b2   :  { %1176 = vmatprep.subr.bf16.mxu0 %v1175_v5 }
 0x1b5   :  { %1178 = vmatpush1.bf16.msra.mxu0 %v1177_v8  ;;  %v1248_v8 = vpack.c.bf16 %v534_v1, %v531_v0 }
 0x1b6   :  { %1180 = vmatprep.subr.bf16.mxu0 %v1179_v13  ;;  %v1219_v13 = vpack.c.bf16 %v539_v4, %v536_v3  ;;  %v1243_v3 = vpack.c.bf16 %v575_v63, %v572_v62  ;;  %v574_v4 = vld [vmem:[#allocation11 + $0x168] sm:$0xff]  ;;  %v789_v63 = vld [vmem:[#allocation12 + $0x50] sm:$0xff] }
 0x1b9   :  { %1182 = vmatpush1.bf16.msra.mxu0 %v1181_v16  ;;  %v540_v16 = vld [vmem:[#allocation11 + $0x58] sm:$0xff] }
 0x1ba   :  { %1184 = vmatprep.subr.bf16.mxu0 %v1183_v19  ;;  %v1221_v19 = vpack.c.bf16 %v538_v14, %v535_v10  ;;  %v1251_v20 = vpack.c.bf16 %v540_v16, %v537_v15  ;;  %v779_v14 = vld [vmem:[#allocation12] sm:$0xff]  ;;  %v780_v15 = vld [vmem:[#allocation12 + $0x8] sm:$0xff]  ;;  %v781_v16 = vld [vmem:[#allocation12 + $0x10] sm:$0xff] }
 0x1bd   :  { %1186 = vmatpush1.bf16.msra.mxu0 %v1185_v22  ;;  %v1223_v22 = vpack.c.bf16 %v545_v18, %v542_v17  ;;  %v1272_v17 = vpack.c.bf16 %v780_v15, %v779_v14  ;;  %v782_v18 = vld [vmem:[#allocation12 + $0x18] sm:$0xff] }
 0x1be   :  { %1188 = vmatprep.subr.bf16.mxu0 %v1187_v51  ;;  %v561_v51 = vld [vmem:[#allocation11 + $0x100] sm:$0xff] }
 0x1bf   :  { %v1263_v56 = vpack.c.bf16 %v564_v52, %v561_v51 }
 0x1c1   :  { %1190 = vmatpush1.bf16.msra.mxu0 %v1189_v55 }
 0x1c2   :  { %1216 = vmatprep.subr.bf16.mxu0 %v1215_v60  ;;  %v567_v60 = vld [vmem:[#allocation11 + $0x130] sm:$0xff] }
 0x277   :  { %v235_v26 = vpop.f32.mrb[0].mxu0 }
 0x278   :  { %v236_v27 = vadd.f32 %v906_v23, %v235_v26  ;;  %v991_v28 = vpop.f32.mrb[1].mxu0  ;;  %v544_v23 = vld [vmem:[#allocation11 + $0x78] sm:$0xff] }
 0x279   :  { %v548_v26 = vld [vmem:[#allocation11 + $0x98] sm:$0xff]  ;;  %v1225_v28 = vpack.c.bf16 %v544_v23, %v541_v21  ;;  %v784_v21 = vld [vmem:[#allocation12 + $0x28] sm:$0xff] }
 0x27a   :  { %v239_v30 = vmax.f32 %v236_v27, 0.0  ;;  %v551_v27 = vld [vmem:[#allocation11 + $0xb0] sm:$0xff] }
 0x27b   :  { %v1227_v31 = vpack.c.bf16 %v551_v27, %v548_v26  ;;  %v137_v27 = vld [vmem:[%s1826_s9] sm:$0x3] }
 0x27c   :  { %1025 = vmatmul.mubr.f32.vlgmr.msra.gmra.mrb[0].mxu1 %v239_v30  ;;  %v547_v30 = vld [vmem:[#allocation11 + $0x90] sm:$0xff] }
 0x27d   :  { %1193 = vmatpush3.bf16.msra.mxu1 %v1192_v29  ;;  %1059 = vmatprep.mubr.msk.f32.mxu1 %vm1528_vm1, %v1529_v11  ;;  %v1254_v29 = vpack.c.bf16 %v546_v25, %v543_v24  ;;  %v1229_v37 = vpack.c.bf16 %v550_v32, %v547_v30  ;;  %v721_v24 = vlaneseq }
 0x27e   :  { %1194 = vmatprep.subr.bf16.mxu1 %v1527_v9 }
 0x27f   :  { %v722_v25 = vshrl.u32 %v721_v24, 7 }
 0x281   :  { %1196 = vmatpush3.bf16.msra.mxu1 %v1195_v33  ;;  %v549_v33 = vld [vmem:[#allocation11 + $0xa0] sm:$0xff]  ;;  %v723_v26 = vsub.s32 0, %v722_v25 }
 0x282   :  { %1197 = vmatprep.subr.bf16.mxu1 %v1527_v9  ;;  %v1257_v38 = vpack.c.bf16 %v552_v34, %v549_v33 }
 0x285   :  { %1199 = vmatpush3.bf16.msra.mxu1 %v1198_v36  ;;  %v557_v36 = vld [vmem:[#allocation11 + $0xe0] sm:$0xff] }
 0x286   :  { %1200 = vmatprep.subr.bf16.mxu1 %v1527_v9  ;;  %v1231_v40 = vpack.c.bf16 %v557_v36, %v554_v35 }
 0x289   :  { %1202 = vmatpush3.bf16.msra.mxu1 %v1201_v39  ;;  %v553_v39 = vld [vmem:[#allocation11 + $0xc0] sm:$0xff] }
 0x28a   :  { %1203 = vmatprep.subr.bf16.mxu1 %v1527_v9  ;;  %v1233_v46 = vpack.c.bf16 %v556_v41, %v553_v39 }
 0x28d   :  { %1205 = vmatpush3.bf16.msra.mxu1 %v1204_v42  ;;  %v555_v42 = vld [vmem:[#allocation11 + $0xd0] sm:$0xff] }
 0x28e   :  { %1206 = vmatprep.subr.bf16.mxu1 %v1527_v9  ;;  %v1260_v47 = vpack.c.bf16 %v558_v43, %v555_v42  ;;  %v912_v42 = vld [vmem:[%s1828_s11] ss:$0 sm:$0xff] }
 0x291   :  { %1208 = vmatpush3.bf16.msra.mxu1 %v1207_v45  ;;  %v563_v45 = vld [vmem:[#allocation11 + $0x110] sm:$0xff] }
 0x292   :  { %1209 = vmatprep.subr.bf16.mxu1 %v1527_v9  ;;  %v1235_v49 = vpack.c.bf16 %v563_v45, %v560_v44  ;;  %v911_v44 = vld [vmem:[%s1827_s10] ss:$0 sm:$0xff]  ;;  %s1531_s10 = smov [#allocation15]  }
 0x293   :  { %s890_s11 = sshll.u32 %s1531_s10, 4  ;;  %s891_s11 = int_to_ptr.vmem [resolvable:$true] %s890_s11 }
 0x294   :  { %s1461_s26 = scalar_lea.vmem %s891_s11, 128  ;;  %p1466_p7 = scmp.lt.s32.totalorder %s891_s11, %s891_s11 }
 0x295   :  { %1211 = vmatpush3.bf16.msra.mxu1 %v1210_v48  ;;  %v559_v48 = vld [vmem:[#allocation11 + $0xf0] sm:$0xff]  ;;  %p1462_p6 = scmp.ne.s32.totalorder %s891_s11, %s1461_s26  ;;  %p1467_p8 = scmp.lt.s32.totalorder %s1461_s26, %s1461_s26 }
 0x296   :  { %1212 = vmatprep.subr.bf16.mxu1 %v1527_v9  ;;  %v1237_v55 = vpack.c.bf16 %v562_v50, %v559_v48 }
 0x297   :  { %p1468_p9 = por %p1467_p8, %p1466_p7 }
 0x299   :  { %1214 = vmatpush3.bf16.msra.mxu1 %v1213_v57  ;;  %v565_v57 = vld [vmem:[#allocation11 + $0x120] sm:$0xff]  ;;  %p1469_p10 = pnand %p1468_p9, %p1462_p6 }
 0x29a   :  { %1247 = vmatprep.subr.bf16.mxu1 %v1527_v9  ;;  %v1241_v0 = vpack.c.bf16 %v568_v59, %v565_v57  ;;  %v785_v57 = vld [vmem:[#allocation12 + $0x30] sm:$0xff] }
 0x34f   :  { %v328_v2 = vpop.f32.mrb[0].mxu1 }
 0x350   :  { %v329_v5 = vadd.f32 %v908_v61, %v328_v2  ;;  %v1026_v6 = vpop.f32.mrb[1].mxu1  ;;  %v570_v61 = vld [vmem:[#allocation11 + $0x148] sm:$0xff]  ;;  %v571_v2 = vld [vmem:[#allocation11 + $0x150] sm:$0xff] }
 0x351   :  { %v1266_v1 = vpack.c.bf16 %v570_v61, %v567_v60  ;;  %v576_v6 = vld [vmem:[#allocation11 + $0x178] sm:$0xff]  ;;  %v1245_v10 = vpack.c.bf16 %v574_v4, %v571_v2  ;;  %v787_v60 = vld [vmem:[#allocation12 + $0x40] sm:$0xff]  ;;  %v788_v61 = vld [vmem:[#allocation12 + $0x48] sm:$0xff] }
 0x352   :  { %v332_v12 = vmax.f32 %v329_v5, 0.0  ;;  %v573_v5 = vld [vmem:[#allocation11 + $0x160] sm:$0xff]  ;;  %v1284_v62 = vpack.c.bf16 %v788_v61, %v787_v60 }
 0x353   :  { %v791_v2 = vld [vmem:[#allocation12 + $0x60] sm:$0xff] }
 0x354   :  { %453 = vmatmul.mubr.f32.vlgmr.msra.gmra.mrb[2].mxu0 %v332_v12  ;;  %1060 = vmatmul.mubr.f32.vlgmr.msra.gmra.mrb[2].mxu1 %v332_v12  ;;  %v1269_v12 = vpack.c.bf16 %v576_v6, %v573_v5  ;;  %v793_v5 = vld [vmem:[#allocation12 + $0x70] sm:$0xff]  ;;  %v794_v6 = vld [vmem:[#allocation12 + $0x78] sm:$0xff] }
 0x355   :  { %1218 = vmatpush1.bf16.msra.mxu0 %v1217_v7  ;;  %1249 = vmatpush3.bf16.msra.mxu1 %v1248_v8  ;;  %v337_v7 = vpop.permute.xlu1 %336  ;;  %v133_v8 = vld [vmem:[#allocation6] sm:$0xff] }
 0x356   :  { %1220 = vmatprep.subr.bf16.mxu0 %v1219_v13  ;;  %1250 = vmatprep.subr.bf16.mxu1 %v1527_v9  ;;  %v339_v13 = vmul.f32 %v337_v7, %v133_v8  ;;  %v1293_v7 = vpack.c.bf16 %v794_v6, %v793_v5 }
 0x357   :  { %641 = vmatprep.mubr.f32.mxu0 %v1529_v11  ;;  %1094 = vmatprep.mubr.msk.f32.mxu1 %vm1528_vm1, %v1529_v11 }
 0x359   :  { %1222 = vmatpush1.bf16.msra.mxu0 %v1221_v19  ;;  %1252 = vmatpush3.bf16.msra.mxu1 %v1251_v20  ;;  %v1275_v19 = vpack.c.bf16 %v782_v18, %v781_v16  ;;  %v783_v20 = vld [vmem:[#allocation12 + $0x20] sm:$0xff] }
 0x35a   :  { %1224 = vmatprep.subr.bf16.mxu0 %v1223_v22  ;;  %1253 = vmatprep.subr.bf16.mxu1 %v1527_v9  ;;  %v1278_v22 = vpack.c.bf16 %v784_v21, %v783_v20 }
 0x35d   :  { %1226 = vmatpush1.bf16.msra.mxu0 %v1225_v28  ;;  %1255 = vmatpush3.bf16.msra.mxu1 %v1254_v29  ;;  %v727_v28 = vsub.s32 1, %v722_v25  ;;  %v724_v29 = vrot.slane %v137_v27, %v723_v26 }
 0x35e   :  { %1228 = vmatprep.subr.bf16.mxu0 %v1227_v31  ;;  %1256 = vmatprep.subr.bf16.mxu1 %v1527_v9 }
 0x35f   :  { %v728_v32 = vrot.slane %v137_v27, %v727_v28 }
 0x361   :  { %1230 = vmatpush1.bf16.msra.mxu0 %v1229_v37  ;;  %1258 = vmatpush3.bf16.msra.mxu1 %v1257_v38 }
 0x362   :  { %1232 = vmatprep.subr.bf16.mxu0 %v1231_v40  ;;  %1259 = vmatprep.subr.bf16.mxu1 %v1527_v9 }
 0x365   :  { %1234 = vmatpush1.bf16.msra.mxu0 %v1233_v46  ;;  %1261 = vmatpush3.bf16.msra.mxu1 %v1260_v47 }
 0x366   :  { %1236 = vmatprep.subr.bf16.mxu0 %v1235_v49  ;;  %1262 = vmatprep.subr.bf16.mxu1 %v1527_v9 }
 0x369   :  { %1238 = vmatpush1.bf16.msra.mxu0 %v1237_v55  ;;  %1264 = vmatpush3.bf16.msra.mxu1 %v1263_v56 }
 0x36a   :  { %1240 = vmatprep.subr.bf16.mxu0 %v1239_v58  ;;  %1265 = vmatprep.subr.bf16.mxu1 %v1527_v9  ;;  %v786_v58 = vld [vmem:[#allocation12 + $0x38] sm:$0xff] }
 0x36b   :  { %v1281_v59 = vpack.c.bf16 %v786_v58, %v785_v57 }
 0x36d   :  { %1242 = vmatpush1.bf16.msra.mxu0 %v1241_v0  ;;  %1267 = vmatpush3.bf16.msra.mxu1 %v1266_v1  ;;  %v790_v0 = vld [vmem:[#allocation12 + $0x58] sm:$0xff] }
 0x36e   :  { %1244 = vmatprep.subr.bf16.mxu0 %v1243_v3  ;;  %1268 = vmatprep.subr.bf16.mxu1 %v1527_v9  ;;  %v1287_v1 = vpack.c.bf16 %v790_v0, %v789_v63  ;;  %v792_v3 = vld [vmem:[#allocation12 + $0x68] sm:$0xff] }
 0x36f   :  { %v1290_v4 = vpack.c.bf16 %v792_v3, %v791_v2 }
 0x371   :  { %1246 = vmatpush1.bf16.msra.mxu0 %v1245_v10  ;;  %1270 = vmatpush3.bf16.msra.mxu1 %v1269_v12 }
 0x372   :  { %1271 = vmatprep.subr.bf16.mxu0 %v1527_v9 }
 0x374   :  { %642 = vmatmul.mubr.f32.vlgmr.msra.gmra.mrb[2].mxu0 %v339_v13  ;;  %1095 = vmatmul.mubr.f32.vlgmr.msra.gmra.mrb[4].mxu1 %v339_v13 }
 0x375   :  { %1129 = vmatprep.mubr.msk.f32.mxu0 %vm1528_vm1, %v1529_v11  ;;  %1273 = vmatpush3.bf16.msra.mxu0 %v1272_v17 }
 0x376   :  { %1274 = vmatprep.subr.bf16.mxu0 %v1527_v9 }
 0x379   :  { %1276 = vmatpush3.bf16.msra.mxu0 %v1275_v19 }
 0x37a   :  { %1277 = vmatprep.subr.bf16.mxu0 %v1527_v9 }
 0x37d   :  { %1279 = vmatpush3.bf16.msra.mxu0 %v1278_v22 }
 0x37e   :  { %1280 = vmatprep.subr.bf16.mxu0 %v1527_v9 }
 0x381   :  { %1282 = vmatpush3.bf16.msra.mxu0 %v1281_v59 }
 0x382   :  { %1283 = vmatprep.subr.bf16.mxu0 %v1527_v9 }
 0x385   :  { %1285 = vmatpush3.bf16.msra.mxu0 %v1284_v62 }
 0x386   :  { %1286 = vmatprep.subr.bf16.mxu0 %v1527_v9 }
 0x389   :  { %1288 = vmatpush3.bf16.msra.mxu0 %v1287_v1 }
 0x38a   :  { %1289 = vmatprep.subr.bf16.mxu0 %v1527_v9 }
 0x38d   :  { %1291 = vmatpush3.bf16.msra.mxu0 %v1290_v4 }
 0x38e   :  { %1292 = vmatprep.subr.bf16.mxu0 %v1527_v9 }
 0x391   :  { %1294 = vmatpush3.bf16.msra.mxu0 %v1293_v7 }
 0x427   :  { %v525_v23 = vpop.f32.mrb[2].mxu1 }
 0x428   :  { %v1061_v11 = vpop.f32.mrb[3].mxu1  ;;  %v751_v47 = vadd.f32 %v911_v44, %v525_v23 }
 0x447   :  { %v643_v30 = vpop.f32.mrb[2].mxu0  ;;  %v714_v31 = vpop.f32.mrb[4].mxu1 }
 0x448   :  { %v731_v33 = vadd.f32 %v724_v29, %v643_v30  ;;  %v645_v34 = vpop.f32.mrb[3].mxu0  ;;  %v1096_v35 = vpop.f32.mrb[5].mxu1  ;;  %v758_v45 = vadd.f32 %v912_v42, %v714_v31 }
 0x449   :  { %v732_v37 = vadd.f32 %v728_v32, %v645_v34 }
 0x44a   :  { %v909_v36 = vmul.f32 -1.442695, %v731_v33 }
 0x44b   :  { %v910_v38 = vmul.f32 -1.442695, %v732_v37 }
 0x44c   :  { %1317 = vpow2.f32 %v909_v36 }
 0x44d   :  { %1319 = vpow2.f32 %v910_v38 }
 0x456   :  { %v1318_v39 = vpop.eup %1317 }
 0x457   :  { %v739_v40 = vadd.f32 1.0, %v1318_v39  ;;  %v1320_v41 = vpop.eup %1319 }
 0x458   :  { %v740_v43 = vadd.f32 1.0, %v1320_v41 }
 0x459   :  { %1321 = vrcp.f32 %v739_v40 }
 0x45a   :  { %1323 = vrcp.f32 %v740_v43 }
 0x463   :  { %v1322_v46 = vpop.eup %1321 }
 0x464   :  { %v759_v48 = vmul.f32 %v1322_v46, %v758_v45  ;;  %v1324_v50 = vpop.eup %1323 }
 0x465   :  { %v762_v51 = vsub.f32 1.0, %v1324_v50  ;;  %v764_v54 = vmul.f32 %v1324_v50, %v339_v13 }
 0x466   :  { %v760_v49 = vadd.f32 %v759_v48, %v751_v47 }
 0x468   :  { %1325 = vtanh.f32 %v760_v49 }
 0x472   :  { %v1326_v52 = vpop.eup %1325 }
 0x473   :  { %v763_v53 = vmul.f32 %v1326_v52, %v762_v51 }
 0x475   :  { %v765_v55 = vadd.f32 %v764_v54, %v763_v53 }
 0x477   :  { %766 = vadd.xlane.f32.xlu1 %v765_v55  ;;  %873 = vst [vmem:[#allocation15] sm:$0xff] %v765_v55  ;;  %v769_v56 = vmul.f32 %v765_v55, %v765_v55 }
 0x479   :  { %770 = vadd.xlane.f32.xlu0 %v769_v56 }
 0x504   :  { %v767_v8 = vpop.xlane.xlu1 %766 }
 0x505   :  { %v768_v10 = vmul.f32 0.03125, %v767_v8 }
 0x506   :  { %v771_v12 = vpop.xlane.xlu0 %770 }
 0x507   :  { %v774_v13 = vmul.f32 %v768_v10, %v768_v10  ;;  %v772_v14 = vmul.f32 0.03125, %v771_v12  ;;  %v773_v17 = vsub.f32 %v765_v55, %v768_v10 }
 0x509   :  { %v775_v15 = vsub.f32 %v772_v14, %v774_v13 }
 0x50b   :  { %v776_v16 = vadd.f32 1e-05, %v775_v15 }
 0x50d   :  { %1327 = vrsqrt.f32 %v776_v16 }
 0x517   :  { %v1328_v18 = vpop.eup %1327 }
 0x518   :  { %v778_v19 = vmul.f32 %v1328_v18, %v773_v17 }
 0x51a   :  { %1130 = vmatmul.mubr.f32.vlgmr.msra.gmra.mrb[4].mxu0 %v778_v19 }
 0x51b   :  { %1472 = shalt.err (!%p1469_p10)
}
 0x51c   :  { %s1473_s29 = scalar_lea.hbm %s1832_s15, 128 }
 0x51d   :  { %p1474_p11 = scmp.ne.s32.totalorder %s1832_s15, %s1473_s29  ;;  %p1477_p12 = scmp.lt.u32.totalorder %s1473_s29, %s1832_s15 }
 0x51f   :  { %p1479_p13 = pnand %p1477_p12, %p1474_p11 }
 0x521   :  { %1482 = shalt.err (!%p1479_p13)
}
 0x522   :  { %893 = dma.vmem_to_hbm [thread:$0]  %s891_s11, 128, %s1832_s15, [#allocation16]   ;;  %v913_v9 = vld [vmem:[%s1830_s13] ss:$0 sm:$0xff] }
 0x523   :  { %s1532_s0 = smov [#allocation14]  }
 0x524   :  { %s880_s30 = sshll.u32 %s1532_s0, 4  ;;  %s881_s30 = int_to_ptr.vmem [resolvable:$true] %s880_s30 }
 0x525   :  { %s1483_s3 = scalar_lea.vmem %s881_s30, 128  ;;  %p1488_p1 = scmp.lt.s32.totalorder %s881_s30, %s881_s30 }
 0x526   :  { %p1484_p0 = scmp.ne.s32.totalorder %s881_s30, %s1483_s3  ;;  %p1489_p2 = scmp.lt.s32.totalorder %s1483_s3, %s1483_s3 }
 0x528   :  { %p1490_p3 = por %p1489_p2, %p1488_p1 }
 0x52a   :  { %p1491_p4 = pnand %p1490_p3, %p1484_p0 }
 0x5ed   :  { %v867_v20 = vpop.f32.mrb[4].mxu0 }
 0x5ee   :  { %v868_v21 = vadd.f32 %v913_v9, %v867_v20  ;;  %v1131_v22 = vpop.f32.mrb[5].mxu0 }
 0x5f0   :  { %871 = vst [vmem:[#allocation14] sm:$0xff] %v868_v21 }
 0x5f1   :  { %1494 = shalt.err (!%p1491_p4)
}
 0x5f2   :  { %s1495_s2 = scalar_lea.hbm %s1831_s14, 128 }
 0x5f3   :  { %p1496_p5 = scmp.ne.s32.totalorder %s1831_s14, %s1495_s2  ;;  %p1499_p6 = scmp.lt.u32.totalorder %s1495_s2, %s1831_s14 }
 0x5f5   :  { %p1501_p7 = pnand %p1499_p6, %p1496_p5 }
 0x5f7   :  { %1504 = shalt.err (!%p1501_p7)
}
 0x5f8   :  { %883 = dma.vmem_to_hbm [thread:$0]  %s881_s30, 128, %s1831_s14, [#allocation5]  }
 0x5f9   :  { %1513 = dma.done.wait [#allocation5], 128  }
 0x5fa   :  { %1514 = vsyncadd [#allocation5], 4294967168 }
 0x5fb   :  { %1515 = dma.done.wait [#allocation16], 128  }
 0x5fc   :  { %1516 = vsyncadd [#allocation16], 4294967168 }
 0x5fd   :  { %900 = vsyncpa [#allocation4], 1 }
 0x5fe   :  { %901 = vsyncpa [#allocation7], 1 }
 0x5ff   :  { %902 = vsyncpa [#allocation10], 1 }
 0x600   :  { %903 = vsyncpa [#allocation13], 1 }
 0x601   :  { %904 = vsyncpa [#allocation5], 1 }
 0x602   :  { %905 = vsyncpa [#allocation16], 1 }

</bundles_post_ra>
